<compile_context>
chip_gen: v5e
topology: v5e:2x2
jax: 0.10.0
libtpu: 0.0.40
codegen_flags: <defaults>
</compile_context>

<pallas_src>
import math

import jax
import jax.numpy as jnp
from jax.experimental import pallas as pl
from jax.experimental.pallas import tpu as pltpu

# Demo shapes (module hardcodes hidden=512, word_dim=1024, vocab=len(picketdata)+4;
# scaled down but kept lane-aligned: all last dims are multiples of 128).
B, S, H, WD, V = 2, 8, 128, 128, 128   # batch, enc-seq, hidden, word_dim, vocab
T = 6                                  # target length (T-1 decode steps)
BP = 8                                 # batch padded to a full f32 sublane group


def _fused_decoder_kernel(
    # scalar prefetch (SMEM)
    use_tf_ref,                                   # (T-1,) int32: 1 => teacher forcing
    # inputs (VMEM; everything resident across the whole time grid)
    tgt_ref,                                      # (T-1, BP, WD) teacher embeddings
    enc_ref,                                      # (BP, S, H)    encoder outputs
    h0_ref,                                       # (BP, H)       initial hidden state
    emb_ref,                                      # (V, WD)       embedding table
    w_att_e_ref, w_att_h_ref, b_att_ref,          # collapsed attention affine map
    wih_w_ref, wih_c_ref, whh_ref, b_lstm_ref,    # LSTM cell
    wout_ref, bout_ref,                           # to_final_output
    # outputs
    logits_ref,                                   # (T-1, BP, V) resident, single writeback
    # scratch (persists across grid steps)
    h_sc, c_sc, prev_emb_sc, att_e_sc,
):
    t = pl.program_id(0)
    hd = h_sc.shape[1]
    vp = logits_ref.shape[2]

    @pl.when(t == 0)
    def _init():
        h_sc[...] = h0_ref[...]
        c_sc[...] = jnp.zeros_like(c_sc)
        # decoder_ciw = ones -> token id 1: broadcast its embedding row in-kernel.
        prev_emb_sc[...] = jnp.broadcast_to(emb_ref[1:2, :], prev_emb_sc.shape)
        # Encoder-dependent part of the (collapsed) attention scores is constant
        # across decode steps: compute once, cache in VMEM scratch.
        w_e = w_att_e_ref[...].reshape(1, 1, hd)
        att_e_sc[...] = jnp.sum(enc_ref[...] * w_e, axis=-1) + b_att_ref[...]

    # --- this step's input word: teacher forcing vs. previous greedy prediction
    use_tf = use_tf_ref[t].astype(jnp.float32)                       # scalar 0.0 / 1.0
    xw = use_tf * tgt_ref[t] + (1.0 - use_tf) * prev_emb_sc[...]     # (BP, WD)

    h = h_sc[...]
    c = c_sc[...]
    enc = enc_ref[...]

    # --- attention: collapsed affine scores + softmax + context contraction
    h_term = jnp.sum(h * w_att_h_ref[...], axis=-1, keepdims=True)   # (BP, 1)
    scores = att_e_sc[...] + h_term                                  # (BP, S)
    scores = scores - jnp.max(scores, axis=1, keepdims=True)
    p = jnp.exp(scores)
    attw = p * pl.reciprocal(jnp.sum(p, axis=1, keepdims=True), approx=True)
    context = jnp.einsum("bqs,bsh->bqh", attw[:, None, :], enc,
                         preferred_element_type=jnp.float32)[:, 0, :]  # (BP, H)

    # --- one LSTM cell step on cat([word, context]); PyTorch gate order i,f,g,o
    gates = (jnp.dot(xw, wih_w_ref[...], preferred_element_type=jnp.float32)
             + jnp.dot(context, wih_c_ref[...], preferred_element_type=jnp.float32)
             + jnp.dot(h, whh_ref[...], preferred_element_type=jnp.float32)
             + b_lstm_ref[...])
    i_g = jax.nn.sigmoid(gates[:, 0:hd])           # 128-aligned lane slices
    f_g = jax.nn.sigmoid(gates[:, hd:2 * hd])
    g_g = jnp.tanh(gates[:, 2 * hd:3 * hd])
    o_g = jax.nn.sigmoid(gates[:, 3 * hd:4 * hd])
    c_new = f_g * c + i_g * g_g
    h_new = o_g * jnp.tanh(c_new)

    # --- vocabulary projection (lane-dense V) into the resident output block
    logits = (jnp.dot(h_new, wout_ref[...], preferred_element_type=jnp.float32)
              + bout_ref[...])

    logits_ref[t] = logits
    h_sc[...] = h_new
    c_sc[...] = c_new

    # --- greedy feedback fully in-kernel: argmax -> one-hot -> embedding gather
    col = jax.lax.broadcasted_iota(jnp.int32, logits.shape, 1).astype(jnp.float32)
    mx = jnp.max(logits, axis=-1, keepdims=True)
    idx = jnp.min(jnp.where(logits == mx, col, float(vp)), axis=-1, keepdims=True)
    onehot = (col == idx).astype(jnp.float32)                        # (BP, V)
    prev_emb_sc[...] = jnp.dot(onehot, emb_ref[...],
                               preferred_element_type=jnp.float32)   # (BP, WD)


@jax.jit
def _fused_decode(use_teacher, tgt_steps, enc, h0, emb_table,
                  w_att_e, w_att_h, b_att,
                  wih_w, wih_c, whh, b_lstm, wout, bout):
    n_steps, bp, wd = tgt_steps.shape
    _, s, hd = enc.shape
    vp = wout.shape[1]

    grid_spec = pltpu.PrefetchScalarGridSpec(
        num_scalar_prefetch=1,
        grid=(n_steps,),
        in_specs=[
            pl.BlockSpec((n_steps, bp, wd), lambda t, tf: (0, 0, 0)),  # teacher embs (resident)
            pl.BlockSpec((bp, s, hd), lambda t, tf: (0, 0, 0)),        # encoder outputs
            pl.BlockSpec((bp, hd), lambda t, tf: (0, 0)),              # h0
            pl.BlockSpec((vp, wd), lambda t, tf: (0, 0)),              # embedding table
            pl.BlockSpec((1, hd), lambda t, tf: (0, 0)),               # w_att_e (collapsed)
            pl.BlockSpec((1, hd), lambda t, tf: (0, 0)),               # w_att_h (collapsed)
            pl.BlockSpec((1, 1), lambda t, tf: (0, 0)),                # b_att   (collapsed)
            pl.BlockSpec((wd, 4 * hd), lambda t, tf: (0, 0)),          # W_ih (word part)
            pl.BlockSpec((hd, 4 * hd), lambda t, tf: (0, 0)),          # W_ih (context part)
            pl.BlockSpec((hd, 4 * hd), lambda t, tf: (0, 0)),          # W_hh
            pl.BlockSpec((1, 4 * hd), lambda t, tf: (0, 0)),           # b_ih + b_hh
            pl.BlockSpec((hd, vp), lambda t, tf: (0, 0)),              # to_final_output W
            pl.BlockSpec((1, vp), lambda t, tf: (0, 0)),               # to_final_output b
        ],
        # Resident output block across the sequential grid axis -> one HBM writeback.
        out_specs=pl.BlockSpec((n_steps, bp, vp), lambda t, tf: (0, 0, 0)),
        scratch_shapes=[
            pltpu.VMEM((bp, hd), jnp.float32),   # h
            pltpu.VMEM((bp, hd), jnp.float32),   # c
            pltpu.VMEM((bp, wd), jnp.float32),   # embedding of previous prediction
            pltpu.VMEM((bp, s), jnp.float32),    # cached encoder-part attention scores
        ],
    )
    return pl.pallas_call(
        _fused_decoder_kernel,
        out_shape=jax.ShapeDtypeStruct((n_steps, bp, vp), jnp.float32),
        grid_spec=grid_spec,
        compiler_params=pltpu.CompilerParams(
            dimension_semantics=("arbitrary",),          # sequential time dependence
            vmem_limit_bytes=32 * 1024 * 1024,
        ),
    )(use_teacher, tgt_steps, enc, h0, emb_table,
      w_att_e, w_att_h, b_att, wih_w, wih_c, whh, b_lstm, wout, bout)


def init_params(key):
    """PyTorch-style uniform +/- 1/sqrt(fan_in); weights stored pre-transposed (in, out)."""
    def lin(k, fan_in, fan_out, bias=True):
        k1, k2 = jax.random.split(k)
        bound = 1.0 / math.sqrt(fan_in)
        w = jax.random.uniform(k1, (fan_in, fan_out), jnp.float32, -bound, bound)
        b = (jax.random.uniform(k2, (1, fan_out), jnp.float32, -bound, bound)
             if bias else None)
        return w, b

    keys = jax.random.split(key, 8)
    p = {}
    p["embedding"] = 0.02 * jax.random.normal(keys[0], (V, WD), jnp.float32)

    # Attention: linear1(cat(enc, hidden)) -> linear2 -> linear3 -> to_weight.
    p["w1"], p["b1"] = lin(keys[1], 2 * H, H)
    p["w2"], p["b2"] = lin(keys[2], H, H)
    p["w3"], p["b3"] = lin(keys[3], H, H)
    p["wa"], _ = lin(keys[4], H, 1, bias=False)

    # LSTM: input = cat([word_embedding, context]) -> split W_ih accordingly.
    wih, bih = lin(keys[5], WD + H, 4 * H)
    p["wih_w"], p["wih_c"], p["bih"] = wih[:WD], wih[WD:], bih
    p["whh"], p["bhh"] = lin(keys[6], H, 4 * H)

    p["wout"], p["bout"] = lin(keys[7], H, V)
    return p


def _collapse_attention(p):
    """linear1 -> linear2 -> linear3 -> to_weight has NO activations in the
    reference module, so it is one affine map: score = [enc, h] @ W + b."""
    chain = p["w2"] @ p["w3"] @ p["wa"]                                        # (H, 1)
    w_att = p["w1"] @ chain                                                    # (2H, 1)
    b_att = ((p["b1"] @ p["w2"] + p["b2"]) @ p["w3"] + p["b3"]) @ p["wa"]      # (1, 1)
    return w_att[:H].T, w_att[H:].T, b_att                                     # (1,H),(1,H),(1,1)


def _expit(x):
    return 1.0 / (1.0 + math.exp(-x))


def _pad_batch(x, bp, axis=0):
    pad = [(0, 0)] * x.ndim
    pad[axis] = (0, bp - x.shape[axis])
    return jnp.pad(x, pad)


def decoder_forward(params, encoder_last_hidden_state, encoder_output, targets,
                    tr_steps=10):
    """Mirrors DecoderNet.forward (mode='train'), fused over all decode steps."""
    _, batch_size, _ = encoder_last_hidden_state.shape
    h0 = encoder_last_hidden_state[0]                      # decoder_chs (B, H)
    emb = params["embedding"]
    tgt_emb = emb[targets]                                 # self.embedding(targets)
    t_len = targets.shape[1]
    n_steps = t_len - 1

    # Scheduled-sampling coin flips.
    # TODO(synk): python random.uniform(0.05, 0.995) is replaced by a
    # deterministic jax.random draw (same semantics, reproducible, no host sync).
    threshold = _expit(tr_steps / 20 + 0.85)
    u = 0.05 + 0.945 * jax.random.uniform(jax.random.PRNGKey(42), (n_steps,))
    use_teacher = (u > threshold).astype(jnp.int32)        # (T-1,)
    # NOTE: self.dropout is defined in __init__ but never applied in forward.

    # Collapse the activation-free attention MLP into one affine map (host side).
    w_att_e, w_att_h, b_att = _collapse_attention(params)
    b_lstm = params["bih"] + params["bhh"]

    # Pad batch to a full f32 sublane group (8) for VPU occupancy; slice back below.
    h0_p = _pad_batch(h0, BP)
    enc_p = _pad_batch(encoder_output, BP)
    tgt_steps = _pad_batch(jnp.transpose(tgt_emb[:, :n_steps], (1, 0, 2)), BP, axis=1)

    logits_seq = _fused_decode(
        use_teacher, tgt_steps, enc_p, h0_p, emb,
        w_att_e, w_att_h, b_att,
        params["wih_w"], params["wih_c"], params["whh"], b_lstm,
        params["wout"], params["bout"])                    # (T-1, BP, V)

    seq = jnp.transpose(logits_seq, (1, 0, 2))[:batch_size]   # (B, T-1, V)
    seq_predictions = jnp.argmax(seq, axis=2)                 # (B, T-1)
    return seq, seq_predictions


if __name__ == "__main__":
    key = jax.random.PRNGKey(0)
    kp, kh, ke, kt = jax.random.split(key, 4)
    params = init_params(kp)

    encoder_last_hidden_state = jax.random.normal(kh, (1, B, H), jnp.float32)
    encoder_output = jax.random.normal(ke, (B, S, H), jnp.float32)
    targets = jax.random.randint(kt, (B, T), 0, V)

    seq, seq_pred = decoder_forward(params, encoder_last_hidden_state,
                                    encoder_output, targets, tr_steps=10)
    jax.block_until_ready((seq, seq_pred))

    assert seq.shape == (B, T - 1, V), seq.shape
    assert seq_pred.shape == (B, T - 1), seq_pred.shape
    assert bool(jnp.all(jnp.isfinite(seq)))
    print("KERNEL_OK")
</pallas_src>

<mosaic_0001>
module attributes {stable_mosaic.version = 11 : i64} {
  func.func @_fused_decoder_kernel(%arg0: i32, %arg1: memref<5xi32, #tpu.memory_space<smem>>, %arg2: memref<5x8x128xf32, #tpu.memory_space<vmem>>, %arg3: memref<8x8x128xf32, #tpu.memory_space<vmem>>, %arg4: memref<8x128xf32, #tpu.memory_space<vmem>>, %arg5: memref<128x128xf32, #tpu.memory_space<vmem>>, %arg6: memref<1x128xf32, #tpu.memory_space<vmem>>, %arg7: memref<1x128xf32, #tpu.memory_space<vmem>>, %arg8: memref<1x1xf32, #tpu.memory_space<vmem>>, %arg9: memref<128x512xf32, #tpu.memory_space<vmem>>, %arg10: memref<128x512xf32, #tpu.memory_space<vmem>>, %arg11: memref<128x512xf32, #tpu.memory_space<vmem>>, %arg12: memref<1x512xf32, #tpu.memory_space<vmem>>, %arg13: memref<128x128xf32, #tpu.memory_space<vmem>>, %arg14: memref<1x128xf32, #tpu.memory_space<vmem>>, %arg15: memref<5x8x128xf32, #tpu.memory_space<vmem>>, %arg16: memref<8x128xf32, #tpu.memory_space<vmem>>, %arg17: memref<8x128xf32, #tpu.memory_space<vmem>>, %arg18: memref<8x128xf32, #tpu.memory_space<vmem>>, %arg19: memref<8x8xf32, #tpu.memory_space<vmem>>) attributes {dimension_semantics = [#tpu.dimension_semantics<arbitrary>], iteration_bounds = array<i64: 5>, scalar_prefetch = 1 : i64, scratch_operands = 4 : i64, tpu.core_type = #tpu.core_type<tc>, window_params = [{pipeline_mode = #tpu.pipeline_mode<synchronous>, transform_indices = @transform_0, window_bounds = array<i64: 5, 8, 128>}, {pipeline_mode = #tpu.pipeline_mode<synchronous>, transform_indices = @transform_1, window_bounds = array<i64: 8, 8, 128>}, {pipeline_mode = #tpu.pipeline_mode<synchronous>, transform_indices = @transform_2, window_bounds = array<i64: 8, 128>}, {pipeline_mode = #tpu.pipeline_mode<synchronous>, transform_indices = @transform_3, window_bounds = array<i64: 128, 128>}, {pipeline_mode = #tpu.pipeline_mode<synchronous>, transform_indices = @transform_4, window_bounds = array<i64: 1, 128>}, {pipeline_mode = #tpu.pipeline_mode<synchronous>, transform_indices = @transform_5, window_bounds = array<i64: 1, 128>}, {pipeline_mode = #tpu.pipeline_mode<synchronous>, transform_indices = @transform_6, window_bounds = array<i64: 1, 1>}, {pipeline_mode = #tpu.pipeline_mode<synchronous>, transform_indices = @transform_7, window_bounds = array<i64: 128, 512>}, {pipeline_mode = #tpu.pipeline_mode<synchronous>, transform_indices = @transform_8, window_bounds = array<i64: 128, 512>}, {pipeline_mode = #tpu.pipeline_mode<synchronous>, transform_indices = @transform_9, window_bounds = array<i64: 128, 512>}, {pipeline_mode = #tpu.pipeline_mode<synchronous>, transform_indices = @transform_10, window_bounds = array<i64: 1, 512>}, {pipeline_mode = #tpu.pipeline_mode<synchronous>, transform_indices = @transform_11, window_bounds = array<i64: 128, 128>}, {pipeline_mode = #tpu.pipeline_mode<synchronous>, transform_indices = @transform_12, window_bounds = array<i64: 1, 128>}, {pipeline_mode = #tpu.pipeline_mode<synchronous>, transform_indices = @transform_13, window_bounds = array<i64: 5, 8, 128>}]} {
    %c0_i32 = arith.constant 0 : i32
    %0 = arith.cmpi eq, %arg0, %c0_i32 : i32
    %1 = arith.extui %0 : i1 to i32
    %c0_i32_0 = arith.constant 0 : i32
    %2 = arith.cmpi ne, %1, %c0_i32_0 : i32
    scf.if %2 {
      %c0_52 = arith.constant 0 : index
      %c0_53 = arith.constant 0 : index
      %104 = vector.load %arg4[%c0_52, %c0_53] : memref<8x128xf32, #tpu.memory_space<vmem>>, vector<8x128xf32>
      %c0_54 = arith.constant 0 : index
      %c0_55 = arith.constant 0 : index
      %105 = vector.load %arg16[%c0_54, %c0_55] : memref<8x128xf32, #tpu.memory_space<vmem>>, vector<8x128xf32>
      tpu.vector_store %arg16[%c0_54, %c0_55], %104 {strides = array<i32>} : memref<8x128xf32, #tpu.memory_space<vmem>>, vector<8x128xf32>,
      %cst_56 = arith.constant 0.000000e+00 : f32
      %106 = vector.broadcast %cst_56 : f32 to vector<8x128xf32>
      %c0_57 = arith.constant 0 : index
      %c0_58 = arith.constant 0 : index
      %107 = vector.load %arg17[%c0_57, %c0_58] : memref<8x128xf32, #tpu.memory_space<vmem>>, vector<8x128xf32>
      tpu.vector_store %arg17[%c0_57, %c0_58], %106 {strides = array<i32>} : memref<8x128xf32, #tpu.memory_space<vmem>>, vector<8x128xf32>,
      %c1 = arith.constant 1 : index
      %c0_59 = arith.constant 0 : index
      %108 = vector.load %arg5[%c1, %c0_59] : memref<128x128xf32, #tpu.memory_space<vmem>>, vector<1x128xf32>
      %109 = vector.shape_cast %108 : vector<1x128xf32> to vector<1x128xf32>
      %110 = vector.broadcast %109 : vector<1x128xf32> to vector<8x128xf32>
      %c0_60 = arith.constant 0 : index
      %c0_61 = arith.constant 0 : index
      %111 = vector.load %arg18[%c0_60, %c0_61] : memref<8x128xf32, #tpu.memory_space<vmem>>, vector<8x128xf32>
      tpu.vector_store %arg18[%c0_60, %c0_61], %110 {strides = array<i32>} : memref<8x128xf32, #tpu.memory_space<vmem>>, vector<8x128xf32>,
      %c0_62 = arith.constant 0 : index
      %c0_63 = arith.constant 0 : index
      %112 = vector.load %arg6[%c0_62, %c0_63] : memref<1x128xf32, #tpu.memory_space<vmem>>, vector<1x128xf32>
      %113 = vector.shape_cast %112 : vector<1x128xf32> to vector<1x1x128xf32>
      %c0_64 = arith.constant 0 : index
      %c0_65 = arith.constant 0 : index
      %c0_66 = arith.constant 0 : index
      %114 = vector.load %arg3[%c0_64, %c0_65, %c0_66] : memref<8x8x128xf32, #tpu.memory_space<vmem>>, vector<8x8x128xf32>
      %115 = vector.broadcast %113 : vector<1x1x128xf32> to vector<8x8x128xf32>
      %116 = arith.mulf %114, %115 : vector<8x8x128xf32>
      %cst_67 = arith.constant dense<0.000000e+00> : vector<8x8xf32>
      %117 = vector.multi_reduction <add>, %116, %cst_67 [2] : vector<8x8x128xf32> to vector<8x8xf32>
      %c0_68 = arith.constant 0 : index
      %c0_69 = arith.constant 0 : index
      %118 = vector.load %arg8[%c0_68, %c0_69] : memref<1x1xf32, #tpu.memory_space<vmem>>, vector<1x1xf32>
      %119 = vector.broadcast %118 : vector<1x1xf32> to vector<8x8xf32>
      %120 = arith.addf %117, %119 : vector<8x8xf32>
      %c0_70 = arith.constant 0 : index
      %c0_71 = arith.constant 0 : index
      %121 = vector.load %arg19[%c0_70, %c0_71] : memref<8x8xf32, #tpu.memory_space<vmem>>, vector<8x8xf32>
      tpu.vector_store %arg19[%c0_70, %c0_71], %120 {strides = array<i32>} : memref<8x8xf32, #tpu.memory_space<vmem>>, vector<8x8xf32>,
    } else {
    }
    %3 = arith.index_cast %arg0 : i32 to index
    %4 = memref.load %arg1[%3] : memref<5xi32, #tpu.memory_space<smem>>
    %5 = arith.sitofp %4 : i32 to f32
    %6 = arith.index_cast %arg0 : i32 to index
    %c0 = arith.constant 0 : index
    %c0_1 = arith.constant 0 : index
    %7 = vector.load %arg2[%6, %c0, %c0_1] : memref<5x8x128xf32, #tpu.memory_space<vmem>>, vector<1x8x128xf32>
    %8 = vector.shape_cast %7 : vector<1x8x128xf32> to vector<8x128xf32>
    %9 = vector.broadcast %5 : f32 to vector<8x128xf32>
    %10 = arith.mulf %9, %8 : vector<8x128xf32>
    %cst = arith.constant 1.000000e+00 : f32
    %11 = arith.subf %cst, %5 : f32
    %c0_2 = arith.constant 0 : index
    %c0_3 = arith.constant 0 : index
    %12 = vector.load %arg18[%c0_2, %c0_3] : memref<8x128xf32, #tpu.memory_space<vmem>>, vector<8x128xf32>
    %13 = vector.broadcast %11 : f32 to vector<8x128xf32>
    %14 = arith.mulf %13, %12 : vector<8x128xf32>
    %15 = arith.addf %10, %14 : vector<8x128xf32>
    %c0_4 = arith.constant 0 : index
    %c0_5 = arith.constant 0 : index
    %16 = vector.load %arg16[%c0_4, %c0_5] : memref<8x128xf32, #tpu.memory_space<vmem>>, vector<8x128xf32>
    %c0_6 = arith.constant 0 : index
    %c0_7 = arith.constant 0 : index
    %17 = vector.load %arg17[%c0_6, %c0_7] : memref<8x128xf32, #tpu.memory_space<vmem>>, vector<8x128xf32>
    %c0_8 = arith.constant 0 : index
    %c0_9 = arith.constant 0 : index
    %c0_10 = arith.constant 0 : index
    %18 = vector.load %arg3[%c0_8, %c0_9, %c0_10] : memref<8x8x128xf32, #tpu.memory_space<vmem>>, vector<8x8x128xf32>
    %c0_11 = arith.constant 0 : index
    %c0_12 = arith.constant 0 : index
    %19 = vector.load %arg7[%c0_11, %c0_12] : memref<1x128xf32, #tpu.memory_space<vmem>>, vector<1x128xf32>
    %20 = vector.broadcast %19 : vector<1x128xf32> to vector<8x128xf32>
    %21 = arith.mulf %16, %20 : vector<8x128xf32>
    %cst_13 = arith.constant dense<0.000000e+00> : vector<8xf32>
    %22 = vector.multi_reduction <add>, %21, %cst_13 [1] : vector<8x128xf32> to vector<8xf32>
    %23 = vector.shape_cast %22 : vector<8xf32> to vector<8x1xf32>
    %c0_14 = arith.constant 0 : index
    %c0_15 = arith.constant 0 : index
    %24 = vector.load %arg19[%c0_14, %c0_15] : memref<8x8xf32, #tpu.memory_space<vmem>>, vector<8x8xf32>
    %25 = vector.broadcast %23 : vector<8x1xf32> to vector<8x8xf32>
    %26 = arith.addf %24, %25 : vector<8x8xf32>
    %cst_16 = arith.constant dense<0xFF800000> : vector<8xf32>
    %27 = vector.multi_reduction <maximumf>, %26, %cst_16 [1] : vector<8x8xf32> to vector<8xf32>
    %28 = vector.shape_cast %27 : vector<8xf32> to vector<8x1xf32>
    %29 = vector.broadcast %28 : vector<8x1xf32> to vector<8x8xf32>
    %30 = arith.subf %26, %29 : vector<8x8xf32>
    %31 = math.exp %30 : vector<8x8xf32>
    %cst_17 = arith.constant dense<0.000000e+00> : vector<8xf32>
    %32 = vector.multi_reduction <add>, %31, %cst_17 [1] : vector<8x8xf32> to vector<8xf32>
    %33 = vector.shape_cast %32 : vector<8xf32> to vector<8x1xf32>
    %34 = tpu.reciprocal %33 {approx = true} : vector<8x1xf32> -> vector<8x1xf32>
    %35 = vector.broadcast %34 : vector<8x1xf32> to vector<8x8xf32>
    %36 = arith.mulf %31, %35 : vector<8x8xf32>
    %37 = vector.shape_cast %36 : vector<8x8xf32> to vector<8x1x8xf32>
    "tpu.trace_start"() <{level = 10 : i32, message = "bqs,bsh->bqh"}> : () -> ()
    %cst_18 = arith.constant dense<0.000000e+00> : vector<8x1x128xf32>
    %38 = tpu.matmul %37, %18, %cst_18 {dimension_numbers = #tpu.dot_dimension_numbers<[2], [1], [1], [2], [0, 0, 0, 1, 1, 2], [0], [0]>} : vector<8x1x8xf32>, vector<8x8x128xf32>, vector<8x1x128xf32> -> vector<8x1x128xf32>
    "tpu.trace_stop"() : () -> ()
    %39 = vector.shape_cast %38 : vector<8x1x128xf32> to vector<8x128xf32>
    %c0_19 = arith.constant 0 : index
    %c0_20 = arith.constant 0 : index
    %40 = vector.load %arg9[%c0_19, %c0_20] : memref<128x512xf32, #tpu.memory_space<vmem>>, vector<128x512xf32>
    %cst_21 = arith.constant dense<0.000000e+00> : vector<8x512xf32>
    %41 = tpu.matmul %15, %40, %cst_21 {dimension_numbers = #tpu.dot_dimension_numbers<[1], [0], [0], [1], [0, 0, 1, 1], [], []>} : vector<8x128xf32>, vector<128x512xf32>, vector<8x512xf32> -> vector<8x512xf32>
    %c0_22 = arith.constant 0 : index
    %c0_23 = arith.constant 0 : index
    %42 = vector.load %arg10[%c0_22, %c0_23] : memref<128x512xf32, #tpu.memory_space<vmem>>, vector<128x512xf32>
    %cst_24 = arith.constant dense<0.000000e+00> : vector<8x512xf32>
    %43 = tpu.matmul %39, %42, %cst_24 {dimension_numbers = #tpu.dot_dimension_numbers<[1], [0], [0], [1], [0, 0, 1, 1], [], []>} : vector<8x128xf32>, vector<128x512xf32>, vector<8x512xf32> -> vector<8x512xf32>
    %44 = arith.addf %41, %43 : vector<8x512xf32>
    %c0_25 = arith.constant 0 : index
    %c0_26 = arith.constant 0 : index
    %45 = vector.load %arg11[%c0_25, %c0_26] : memref<128x512xf32, #tpu.memory_space<vmem>>, vector<128x512xf32>
    %cst_27 = arith.constant dense<0.000000e+00> : vector<8x512xf32>
    %46 = tpu.matmul %16, %45, %cst_27 {dimension_numbers = #tpu.dot_dimension_numbers<[1], [0], [0], [1], [0, 0, 1, 1], [], []>} : vector<8x128xf32>, vector<128x512xf32>, vector<8x512xf32> -> vector<8x512xf32>
    %47 = arith.addf %44, %46 : vector<8x512xf32>
    %c0_28 = arith.constant 0 : index
    %c0_29 = arith.constant 0 : index
    %48 = vector.load %arg12[%c0_28, %c0_29] : memref<1x512xf32, #tpu.memory_space<vmem>>, vector<1x512xf32>
    %49 = vector.broadcast %48 : vector<1x512xf32> to vector<8x512xf32>
    %50 = arith.addf %47, %49 : vector<8x512xf32>
    %51 = vector.extract_strided_slice %50 {offsets = [0, 0], sizes = [8, 128], strides = [1, 1]} : vector<8x512xf32> to vector<8x128xf32>
    %52 = arith.negf %51 : vector<8x128xf32>
    %53 = math.exp %52 : vector<8x128xf32>
    %cst_30 = arith.constant 1.000000e+00 : f32
    %54 = vector.broadcast %cst_30 : f32 to vector<8x128xf32>
    %55 = arith.addf %54, %53 : vector<8x128xf32>
    %56 = arith.divf %54, %55 : vector<8x128xf32>
    %57 = vector.extract_strided_slice %50 {offsets = [0, 128], sizes = [8, 128], strides = [1, 1]} : vector<8x512xf32> to vector<8x128xf32>
    %58 = arith.negf %57 : vector<8x128xf32>
    %59 = math.exp %58 : vector<8x128xf32>
    %cst_31 = arith.constant 1.000000e+00 : f32
    %60 = vector.broadcast %cst_31 : f32 to vector<8x128xf32>
    %61 = arith.addf %60, %59 : vector<8x128xf32>
    %62 = arith.divf %60, %61 : vector<8x128xf32>
    %63 = vector.extract_strided_slice %50 {offsets = [0, 256], sizes = [8, 128], strides = [1, 1]} : vector<8x512xf32> to vector<8x128xf32>
    %64 = math.tanh %63 : vector<8x128xf32>
    %65 = vector.extract_strided_slice %50 {offsets = [0, 384], sizes = [8, 128], strides = [1, 1]} : vector<8x512xf32> to vector<8x128xf32>
    %66 = arith.negf %65 : vector<8x128xf32>
    %67 = math.exp %66 : vector<8x128xf32>
    %cst_32 = arith.constant 1.000000e+00 : f32
    %68 = vector.broadcast %cst_32 : f32 to vector<8x128xf32>
    %69 = arith.addf %68, %67 : vector<8x128xf32>
    %70 = arith.divf %68, %69 : vector<8x128xf32>
    %71 = arith.mulf %62, %17 : vector<8x128xf32>
    %72 = arith.mulf %56, %64 : vector<8x128xf32>
    %73 = arith.addf %71, %72 : vector<8x128xf32>
    %74 = math.tanh %73 : vector<8x128xf32>
    %75 = arith.mulf %70, %74 : vector<8x128xf32>
    %c0_33 = arith.constant 0 : index
    %c0_34 = arith.constant 0 : index
    %76 = vector.load %arg13[%c0_33, %c0_34] : memref<128x128xf32, #tpu.memory_space<vmem>>, vector<128x128xf32>
    %cst_35 = arith.constant dense<0.000000e+00> : vector<8x128xf32>
    %77 = tpu.matmul %75, %76, %cst_35 {dimension_numbers = #tpu.dot_dimension_numbers<[1], [0], [0], [1], [0, 0, 1, 1], [], []>} : vector<8x128xf32>, vector<128x128xf32>, vector<8x128xf32> -> vector<8x128xf32>
    %c0_36 = arith.constant 0 : index
    %c0_37 = arith.constant 0 : index
    %78 = vector.load %arg14[%c0_36, %c0_37] : memref<1x128xf32, #tpu.memory_space<vmem>>, vector<1x128xf32>
    %79 = vector.broadcast %78 : vector<1x128xf32> to vector<8x128xf32>
    %80 = arith.addf %77, %79 : vector<8x128xf32>
    %81 = arith.index_cast %arg0 : i32 to index
    %c0_38 = arith.constant 0 : index
    %c0_39 = arith.constant 0 : index
    %82 = vector.load %arg15[%81, %c0_38, %c0_39] : memref<5x8x128xf32, #tpu.memory_space<vmem>>, vector<1x8x128xf32>
    %83 = vector.shape_cast %82 : vector<1x8x128xf32> to vector<8x128xf32>
    %84 = vector.shape_cast %80 : vector<8x128xf32> to vector<1x8x128xf32>
    tpu.vector_store %arg15[%81, %c0_38, %c0_39], %84 {strides = array<i32>} : memref<5x8x128xf32, #tpu.memory_space<vmem>>, vector<1x8x128xf32>,
    %c0_40 = arith.constant 0 : index
    %c0_41 = arith.constant 0 : index
    %85 = vector.load %arg16[%c0_40, %c0_41] : memref<8x128xf32, #tpu.memory_space<vmem>>, vector<8x128xf32>
    tpu.vector_store %arg16[%c0_40, %c0_41], %75 {strides = array<i32>} : memref<8x128xf32, #tpu.memory_space<vmem>>, vector<8x128xf32>,
    %c0_42 = arith.constant 0 : index
    %c0_43 = arith.constant 0 : index
    %86 = vector.load %arg17[%c0_42, %c0_43] : memref<8x128xf32, #tpu.memory_space<vmem>>, vector<8x128xf32>
    tpu.vector_store %arg17[%c0_42, %c0_43], %73 {strides = array<i32>} : memref<8x128xf32, #tpu.memory_space<vmem>>, vector<8x128xf32>,
    %87 = tpu.iota {dimensions = array<i32: 1>} : vector<8x128xi32>
    %88 = arith.sitofp %87 : vector<8x128xi32> to vector<8x128xf32>
    %cst_44 = arith.constant dense<0xFF800000> : vector<8xf32>
    %89 = vector.multi_reduction <maximumf>, %80, %cst_44 [1] : vector<8x128xf32> to vector<8xf32>
    %90 = vector.shape_cast %89 : vector<8xf32> to vector<8x1xf32>
    %91 = vector.broadcast %90 : vector<8x1xf32> to vector<8x128xf32>
    %92 = arith.cmpf oeq, %80, %91 : vector<8x128xf32>
    %cst_45 = arith.constant 1.280000e+02 : f32
    %93 = vector.broadcast %cst_45 : f32 to vector<8x128xf32>
    %94 = arith.select %92, %88, %93 : vector<8x128xi1>, vector<8x128xf32>
    %cst_46 = arith.constant dense<0x7F800000> : vector<8xf32>
    %95 = vector.multi_reduction <minimumf>, %94, %cst_46 [1] : vector<8x128xf32> to vector<8xf32>
    %96 = vector.shape_cast %95 : vector<8xf32> to vector<8x1xf32>
    %97 = vector.broadcast %96 : vector<8x1xf32> to vector<8x128xf32>
    %98 = arith.cmpf oeq, %88, %97 : vector<8x128xf32>
    %99 = arith.extui %98 : vector<8x128xi1> to vector<8x128xi32>
    %100 = arith.sitofp %99 : vector<8x128xi32> to vector<8x128xf32>
    %c0_47 = arith.constant 0 : index
    %c0_48 = arith.constant 0 : index
    %101 = vector.load %arg5[%c0_47, %c0_48] : memref<128x128xf32, #tpu.memory_space<vmem>>, vector<128x128xf32>
    %cst_49 = arith.constant dense<0.000000e+00> : vector<8x128xf32>
    %102 = tpu.matmul %100, %101, %cst_49 {dimension_numbers = #tpu.dot_dimension_numbers<[1], [0], [0], [1], [0, 0, 1, 1], [], []>} : vector<8x128xf32>, vector<128x128xf32>, vector<8x128xf32> -> vector<8x128xf32>
    %c0_50 = arith.constant 0 : index
    %c0_51 = arith.constant 0 : index
    %103 = vector.load %arg18[%c0_50, %c0_51] : memref<8x128xf32, #tpu.memory_space<vmem>>, vector<8x128xf32>
    tpu.vector_store %arg18[%c0_50, %c0_51], %102 {strides = array<i32>} : memref<8x128xf32, #tpu.memory_space<vmem>>, vector<8x128xf32>,
    return
  }
  func.func @transform_0(%arg0: i32, %arg1: memref<5xi32, #tpu.memory_space<smem>>) -> (i32, i32, i32) {
    %c0_i32 = arith.constant 0 : i32
    %c0_i32_0 = arith.constant 0 : i32
    %c0_i32_1 = arith.constant 0 : i32
    %c0_i32_2 = arith.constant 0 : i32
    return %c0_i32, %c0_i32_0, %c0_i32_1 : i32, i32, i32
  }
  func.func @transform_1(%arg0: i32, %arg1: memref<5xi32, #tpu.memory_space<smem>>) -> (i32, i32, i32) {
    %c0_i32 = arith.constant 0 : i32
    %c0_i32_0 = arith.constant 0 : i32
    %c0_i32_1 = arith.constant 0 : i32
    %c0_i32_2 = arith.constant 0 : i32
    return %c0_i32, %c0_i32_0, %c0_i32_1 : i32, i32, i32
  }
  func.func @transform_2(%arg0: i32, %arg1: memref<5xi32, #tpu.memory_space<smem>>) -> (i32, i32) {
    %c0_i32 = arith.constant 0 : i32
    %c0_i32_0 = arith.constant 0 : i32
    %c0_i32_1 = arith.constant 0 : i32
    return %c0_i32, %c0_i32_0 : i32, i32
  }
  func.func @transform_3(%arg0: i32, %arg1: memref<5xi32, #tpu.memory_space<smem>>) -> (i32, i32) {
    %c0_i32 = arith.constant 0 : i32
    %c0_i32_0 = arith.constant 0 : i32
    %c0_i32_1 = arith.constant 0 : i32
    return %c0_i32, %c0_i32_0 : i32, i32
  }
  func.func @transform_4(%arg0: i32, %arg1: memref<5xi32, #tpu.memory_space<smem>>) -> (i32, i32) {
    %c0_i32 = arith.constant 0 : i32
    %c0_i32_0 = arith.constant 0 : i32
    %c0_i32_1 = arith.constant 0 : i32
    return %c0_i32, %c0_i32_0 : i32, i32
  }
  func.func @transform_5(%arg0: i32, %arg1: memref<5xi32, #tpu.memory_space<smem>>) -> (i32, i32) {
    %c0_i32 = arith.constant 0 : i32
    %c0_i32_0 = arith.constant 0 : i32
    %c0_i32_1 = arith.constant 0 : i32
    return %c0_i32, %c0_i32_0 : i32, i32
  }
  func.func @transform_6(%arg0: i32, %arg1: memref<5xi32, #tpu.memory_space<smem>>) -> (i32, i32) {
    %c0_i32 = arith.constant 0 : i32
    %c0_i32_0 = arith.constant 0 : i32
    %c0_i32_1 = arith.constant 0 : i32
    return %c0_i32, %c0_i32_0 : i32, i32
  }
  func.func @transform_7(%arg0: i32, %arg1: memref<5xi32, #tpu.memory_space<smem>>) -> (i32, i32) {
    %c0_i32 = arith.constant 0 : i32
    %c0_i32_0 = arith.constant 0 : i32
    %c0_i32_1 = arith.constant 0 : i32
    return %c0_i32, %c0_i32_0 : i32, i32
  }
  func.func @transform_8(%arg0: i32, %arg1: memref<5xi32, #tpu.memory_space<smem>>) -> (i32, i32) {
    %c0_i32 = arith.constant 0 : i32
    %c0_i32_0 = arith.constant 0 : i32
    %c0_i32_1 = arith.constant 0 : i32
    return %c0_i32, %c0_i32_0 : i32, i32
  }
  func.func @transform_9(%arg0: i32, %arg1: memref<5xi32, #tpu.memory_space<smem>>) -> (i32, i32) {
    %c0_i32 = arith.constant 0 : i32
    %c0_i32_0 = arith.constant 0 : i32
    %c0_i32_1 = arith.constant 0 : i32
    return %c0_i32, %c0_i32_0 : i32, i32
  }
  func.func @transform_10(%arg0: i32, %arg1: memref<5xi32, #tpu.memory_space<smem>>) -> (i32, i32) {
    %c0_i32 = arith.constant 0 : i32
    %c0_i32_0 = arith.constant 0 : i32
    %c0_i32_1 = arith.constant 0 : i32
    return %c0_i32, %c0_i32_0 : i32, i32
  }
  func.func @transform_11(%arg0: i32, %arg1: memref<5xi32, #tpu.memory_space<smem>>) -> (i32, i32) {
    %c0_i32 = arith.constant 0 : i32
    %c0_i32_0 = arith.constant 0 : i32
    %c0_i32_1 = arith.constant 0 : i32
    return %c0_i32, %c0_i32_0 : i32, i32
  }
  func.func @transform_12(%arg0: i32, %arg1: memref<5xi32, #tpu.memory_space<smem>>) -> (i32, i32) {
    %c0_i32 = arith.constant 0 : i32
    %c0_i32_0 = arith.constant 0 : i32
    %c0_i32_1 = arith.constant 0 : i32
    return %c0_i32, %c0_i32_0 : i32, i32
  }
  func.func @transform_13(%arg0: i32, %arg1: memref<5xi32, #tpu.memory_space<smem>>) -> (i32, i32, i32) {
    %c0_i32 = arith.constant 0 : i32
    %c0_i32_0 = arith.constant 0 : i32
    %c0_i32_1 = arith.constant 0 : i32
    %c0_i32_2 = arith.constant 0 : i32
    return %c0_i32, %c0_i32_0, %c0_i32_1 : i32, i32, i32
  }
}

</mosaic_0001>

<bundles_post_ra>
// kernel: _fused_decode.1
= control target key start
LH: loop header
LB: loop body
LE: loop exit
PB: predicated region body
PF: predicated region fallthrough
CT: control target
= control target key end

     0   :  { %s2114_s18 = smov [#allocation7]   ;;  %s2375_s0 = inlined_call_operand.vmem [shape: s32[5], index: 0, kind: input, shape index: {}]   ;;  %s2376_s1 = inlined_call_operand.hbm [shape: f32[5,8,128], index: 1, kind: input, shape index: {}]   ;;  %s2377_s2 = inlined_call_operand.hbm [shape: f32[8,8,128], index: 2, kind: input, shape index: {}]   ;;  %s2378_s3 = inlined_call_operand.hbm [shape: f32[8,128], index: 3, kind: input, shape index: {}]   ;;  %s2379_s4 = inlined_call_operand.hbm [shape: f32[128,128], index: 4, kind: input, shape index: {}]   ;;  %s2380_s5 = inlined_call_operand.vmem [shape: f32[1,128], index: 5, kind: input, shape index: {}]   ;;  %s2381_s6 = inlined_call_operand.vmem [shape: f32[1,128], index: 6, kind: input, shape index: {}]   ;;  %s2382_s8 = inlined_call_operand.hbm [shape: f32[128,512], index: 8, kind: input, shape index: {}]   ;;  %s2383_s9 = inlined_call_operand.hbm [shape: f32[128,512], index: 9, kind: input, shape index: {}]   ;;  %s2384_s10 = inlined_call_operand.hbm [shape: f32[128,512], index: 10, kind: input, shape index: {}]   ;;  %s2385_s11 = inlined_call_operand.vmem [shape: f32[1,512], index: 11, kind: input, shape index: {}]   ;;  %s2386_s12 = inlined_call_operand.hbm [shape: f32[128,128], index: 12, kind: input, shape index: {}]   ;;  %s2387_s13 = inlined_call_operand.vmem [shape: f32[1,128], index: 13, kind: input, shape index: {}]   ;;  %s2388_s14 = inlined_call_operand.hbm [shape: f32[5,8,128], index: 14, kind: output, shape index: {}]   ;;  %s2389_s7 = inlined_call_operand.<no memory space> [shape: f32[1,1], index: 7, kind: input, shape index: {}]  }
   0x1   :  { %2392 = sst [smem:[#allocation31_spill]] %s2376_s1  ;;  %s20_s15 = sshll.u32 %s2375_s0, 4  ;;  %v24_v0 = vstv %s2389_s7  ;;  %s21_s15 = int_to_ptr.vmem [resolvable:$true] %s20_s15 }
   0x2   :  { %2393 = sst [smem:[#allocation32_spill]] %s2377_s2  ;;  %25 = vst [vmem:[#allocation8] sm:$0x1] %v24_v0 }
   0x3   :  { %2394 = sst [smem:[#allocation33_spill]] %s2378_s3 }
   0x4   :  { %23 = dma.vmem_to_smem %s21_s15, 16, %s2114_s18, [#allocation6] }
   0x5   :  { %2084 = dma.done.wait [#allocation6], 16 }
   0x6   :  { %2085 = vsyncadd [#allocation6], 4294967280 }
   0x7   :  { %28 = sfence }
   0x8   :  { %29 = vsyncpa [#allocation10], 0 }
   0x9   :  { %30 = vsyncpa [#allocation13], 0 }
   0xa   :  { %31 = vsyncpa [#allocation16], 0 }
   0xb   :  { %32 = vsyncpa [#allocation19], 0 }
   0xc   :  { %33 = vsyncpa [#allocation22], 0 }
   0xd   :  { %34 = vsyncpa [#allocation11], 0  ;;  %s2214_s19 = smov 0  }
   0xe LB: > { %s2220_s0 = sadd.s32 4294967295, %s2112_s19   ;;  %p1630_p0 = scmp.ge.s32.totalorder %s2112_s19, 1  ;;  %s2112_s19 = sphi %s2214_s19, %s40_s19  }
   0xf   : > { %p339_p1 = scmp.lt.s32.totalorder %s2112_s19, 6  ;;  %p1631_p2 = scmp.ne.s32.totalorder %s2220_s0, 0 }
  0x10   : > { %p1728_p3 = scmp.eq.s32.totalorder %s2220_s0, 0  ;;  %s2395_s2 = sld [smem:[#allocation32_spill]] }
  0x11   : > { %p2229_p4 = pnand %p1630_p0, %p339_p1  ;;  %s390_s25 = sshll.u32 %s2379_s4, 4  ;;  %s391_s25 = int_to_ptr.hbm [resolvable:$true] %s390_s25 }
  0x12   : > { %s2115_s26 = smov [#allocation12]   ;;  %s2116_s29 = smov [#allocation15]  }
  0x13   : > { %p1703_p5 = pneg %p2229_p4  ;;  %s366_s27 = sshll.u32 %s2115_s26, 4  ;;  %s367_s27 = int_to_ptr.vmem [resolvable:$true] %s366_s27 }
  0x14   : > { %s392_s30 = sshll.u32 %s2116_s29, 4  ;;  %s2390_s15 = smov 128   ;;  %s393_s30 = int_to_ptr.vmem [resolvable:$true] %s392_s30 }
  0x15   : > { %p2240_p6 = pnand %p1728_p3, %p1703_p5  ;;  %s2118_s16 = smov 8  }
  0x16   : > { %s364_s21 = sshll.u32 %s2395_s2, 4  ;;  %s427_s7 = sshll.u32 %s2383_s9, 4  ;;  %s365_s21 = int_to_ptr.hbm [resolvable:$true] %s364_s21  ;;  %s428_s7 = int_to_ptr.hbm [resolvable:$true] %s427_s7 }
  0x17   : > { %1709 = dma.hbm_to_vmem [thread:$0]  (!%p2240_p6), %s365_s21, 1024, %s367_s27, [#allocation13], %s2390_s15, %s2390_s15, %s2118_s16  }
  0x18   : > { %1715 = dma.hbm_to_vmem [thread:$0]  (!%p2240_p6), %s391_s25, 2048, %s393_s30, [#allocation16], %s2390_s15, %s2390_s15, %s2118_s16  }
  0x19   : > { %s2119_s20 = smov [#allocation18]   ;;  %s2398_s1 = sld [smem:[#allocation31_spill]] }
  0x1a   : > { %s429_s23 = sshll.u32 %s2119_s20, 4  ;;  %s2120_s21 = smov 512   ;;  %s430_s23 = int_to_ptr.vmem [resolvable:$true] %s429_s23 }
  0x1b   : > { %s2121_s27 = smov 32   ;;  %s2399_s3 = sld [smem:[#allocation33_spill]] }
  0x1c   : > { %1721 = dma.hbm_to_vmem [thread:$0]  (!%p2240_p6), %s428_s7, 8192, %s430_s23, [#allocation19], %s2120_s21, %s2120_s21, %s2121_s27  }
  0x1d   : > { %s2122_s18 = smov [#allocation9]   ;;  %s2400_s20 = smov 128  }
  0x1e   : > { %s352_s15 = sshll.u32 %s2122_s18, 4  ;;  %s2123_s24 = smov [#allocation14]   ;;  %s353_s15 = int_to_ptr.vmem [resolvable:$true] %s352_s15 }
  0x1f   : > { %s350_s29 = sshll.u32 %s2398_s1, 4  ;;  %s381_s26 = sshll.u32 %s2123_s24, 4  ;;  %s351_s29 = int_to_ptr.hbm [resolvable:$true] %s350_s29  ;;  %s382_s26 = int_to_ptr.vmem [resolvable:$true] %s381_s26 }
  0x20   : > { %1706 = dma.hbm_to_vmem [thread:$0]  (!%p2240_p6), %s351_s29, 640, %s353_s15, [#allocation10], %s2400_s20, %s2400_s20, %s2118_s16  }
  0x21   : > { %s379_s17 = sshll.u32 %s2399_s3, 4  ;;  %s413_s7 = sshll.u32 %s2382_s8, 4  ;;  %s380_s17 = int_to_ptr.hbm [resolvable:$true] %s379_s17  ;;  %s414_s7 = int_to_ptr.hbm [resolvable:$true] %s413_s7 }
  0x22   : > { %1712 = dma.hbm_to_vmem [thread:$0]  (!%p2240_p6), %s380_s17, 128, %s382_s26, [#allocation13]  }
  0x23   : > { %s441_s30 = sshll.u32 %s2384_s10, 4  ;;  %s2124_s18 = smov [#allocation17]   ;;  %s442_s30 = int_to_ptr.hbm [resolvable:$true] %s441_s30 }
  0x24   : > { %s415_s3 = sshll.u32 %s2124_s18, 4  ;;  %s2125_s15 = smov [#allocation20]   ;;  %s416_s3 = int_to_ptr.vmem [resolvable:$true] %s415_s3 }
  0x25   : > { %1718 = dma.hbm_to_vmem [thread:$0]  (!%p2240_p6), %s414_s7, 8192, %s416_s3, [#allocation16], %s2120_s21, %s2120_s21, %s2121_s27  }
  0x26   : > { %s443_s29 = sshll.u32 %s2125_s15, 4  ;;  %s458_s2 = sshll.u32 %s2386_s12, 4  ;;  %s444_s29 = int_to_ptr.vmem [resolvable:$true] %s443_s29  ;;  %s459_s2 = int_to_ptr.hbm [resolvable:$true] %s458_s2 }
  0x27   : > { %1724 = dma.hbm_to_vmem [thread:$0]  (!%p2240_p6), %s442_s30, 8192, %s444_s29, [#allocation19], %s2120_s21, %s2120_s21, %s2121_s27  }
  0x28   : > { %s2126_s17 = smov [#allocation21]   ;;  %479 = sbr.rel (%p2229_p4) target bundleno = 1452 (0x5ac), region = 72 }
  0x29   : > { %s460_s26 = sshll.u32 %s2126_s17, 4  ;;  %s461_s26 = int_to_ptr.vmem [resolvable:$true] %s460_s26 }
  0x2a   : > { %1727 = dma.hbm_to_vmem [thread:$0]  (!%p2240_p6), %s459_s2, 2048, %s461_s26, [#allocation22], %s2400_s20, %s2400_s20, %s2118_s16  }
  0x2d   : > { %2087 = dma.done.wait (%p1728_p3), [#allocation10], 640  }
  0x2e   : > { %2089 = vsyncadd (%p1728_p3), [#allocation10], 4294966656 }
  0x2f   : > { %2091 = dma.done.wait (%p1728_p3), [#allocation13], 1152  }
  0x30   : > { %2093 = vsyncadd (%p1728_p3), [#allocation13], 4294966144 }
  0x31   : > { %2095 = dma.done.wait (%p1728_p3), [#allocation16], 10240  }
  0x32   : > { %2097 = vsyncadd (%p1728_p3), [#allocation16], 4294957056 }
  0x33   : > { %2099 = dma.done.wait (%p1728_p3), [#allocation19], 16384  }
  0x34   : > { %2101 = vsyncadd (%p1728_p3), [#allocation19], 4294950912 }
  0x35   : > { %2103 = dma.done.wait (%p1728_p3), [#allocation22], 2048  }
  0x36   : > { %2105 = vsyncadd (%p1728_p3), [#allocation22], 4294965248  ;;  %552 = sbr.rel (%p1631_p2) target bundleno = 215 (0xd7), region = 108 }
  0x3b   : > { %v562_v1 = vld [vmem:[#allocation12 + $0x10] sm:$0xff]  ;;  %v560_v3 = vld [vmem:[#allocation12] sm:$0xff]  ;;  %v563_v4 = vld [vmem:[#allocation12 + $0x18] sm:$0xff]  ;;  %v2127_v5 = vmov 0   ;;  %v2128_v24 = vmov 0.0   ;;  %v618_v29 = vlaneseq  ;;  %vm628_vm0 = vcmask 1041409  }
  0x3c   : > { %v1775_v2 = vld [vmem:[%s2380_s5] ss:$0 sm:$0xff]  ;;  %1773 = vset.pattern.permute.xlu1 %v2127_v5  ;;  %1774 = vset.pattern.permute.xlu0 %v2127_v5  ;;  %v561_v9 = vld [vmem:[#allocation12 + $0x8] sm:$0xff]  ;;  %v564_v10 = vld [vmem:[#allocation12 + $0x20] sm:$0xff]  ;;  %555 = vst [vmem:[#allocation3] sm:$0xff] %v2128_v24  ;;  %vm630_vm1 = vcmask 1042434  }
  0x3d   : > { %v573_v6 = vmul.f32 %v1775_v2, %v562_v1  ;;  %v571_v7 = vmul.f32 %v1775_v2, %v560_v3  ;;  %v574_v8 = vmul.f32 %v1775_v2, %v563_v4  ;;  %v572_v11 = vmul.f32 %v1775_v2, %v561_v9  ;;  %v565_v13 = vld [vmem:[#allocation12 + $0x28] sm:$0xff]  ;;  %v566_v14 = vld [vmem:[#allocation12 + $0x30] sm:$0xff]  ;;  %v567_v17 = vld [vmem:[#allocation12 + $0x38] sm:$0xff] }
  0x3e   : > { %v575_v12 = vmul.f32 %v1775_v2, %v564_v10  ;;  %v576_v15 = vmul.f32 %v1775_v2, %v565_v13  ;;  %v577_v16 = vmul.f32 %v1775_v2, %v566_v14  ;;  %v578_v18 = vmul.f32 %v1775_v2, %v567_v17  ;;  %v1776_v19 = vld [vmem:[#allocation8] ss:$0 sm:$0xff]  ;;  %v1777_v21 = vld [vmem:[#allocation15 + $0x1] ss:$0 sm:$0xff]  ;;  %v553_v22 = vld [vmem:[#allocation14] sm:$0xff] }
  0x3f   : > { %583 = vadd.xlane.f32.xlu1 %v573_v6  ;;  %579 = vadd.xlane.f32.xlu0 %v571_v7  ;;  %554 = vst [vmem:[#allocation2] sm:$0xff] %v553_v22  ;;  %v619_v30 = vand.u32 127, %v618_v29  ;;  %vm632_vm2 = vcmask 1043459   ;;  %vm634_vm3 = vcmask 1044484   ;;  %vm636_vm4 = vcmask 1045509  }
  0x40   : > { %585 = vadd.xlane.f32.xlu2 %v574_v8  ;;  %558 = vst [vmem:[#allocation4] sm:$0xff] %v1777_v21  ;;  %vm638_vm5 = vcmask 1046534   ;;  %vm640_vm6 = vcmask 1047559   ;;  %vm643_vm7 = vcmask 64512  }
  0x47   : > { %581 = vadd.xlane.f32.xlu0 %v572_v11 }
  0x48   : > { %587 = vadd.xlane.f32.xlu2 %v575_v12 }
  0x4f   : > { %589 = vadd.xlane.f32.xlu0 %v576_v15 }
  0x50   : > { %591 = vadd.xlane.f32.xlu2 %v577_v16 }
  0x57   : > { %593 = vadd.xlane.f32.xlu0 %v578_v18 }
  0x58   : > { %599 = vperm.xlu1 %1773, %v1776_v19  }
  0xb2   : > { %v580_v20 = vpop.xlane.xlu0 %579  ;;  %v584_v27 = vpop.xlane.xlu1 %583 }
  0xb3   : > { %v586_v23 = vpop.xlane.xlu2 %585 }
  0xba   : > { %v582_v25 = vpop.xlane.xlu0 %581 }
  0xbb   : > { %v588_v26 = vpop.xlane.xlu2 %587 }
  0xc2   : > { %v590_v28 = vpop.xlane.xlu0 %589 }
  0xc3   : > { %v592_v32 = vpop.xlane.xlu2 %591 }
  0xca   : > { %v600_v31 = vpop.permute.xlu1 %599  ;;  %v594_v38 = vpop.xlane.xlu0 %593 }
  0xcb   : > { %v602_v33 = vadd.f32 %v600_v31, %v580_v20  ;;  %v603_v34 = vadd.f32 %v600_v31, %v582_v25  ;;  %v604_v35 = vadd.f32 %v600_v31, %v584_v27  ;;  %v605_v36 = vadd.f32 %v600_v31, %v586_v23 }
  0xcc   : > { %v606_v37 = vadd.f32 %v600_v31, %v588_v26  ;;  %v607_v39 = vadd.f32 %v600_v31, %v590_v28  ;;  %v608_v43 = vadd.f32 %v600_v31, %v592_v32  ;;  %v609_v46 = vadd.f32 %v600_v31, %v594_v38 }
  0xcd   : > { %v620_v40 = vperm.slane %v602_v33, %v619_v30  ;;  %v621_v41 = vperm.slane %v603_v34, %v619_v30  ;;  %v622_v42 = vperm.slane %v604_v35, %v619_v30  ;;  %v623_v44 = vperm.slane %v605_v36, %v619_v30 }
  0xce   : > { %v624_v47 = vperm.slane %v606_v37, %v619_v30  ;;  %v625_v49 = vperm.slane %v607_v39, %v619_v30  ;;  %v626_v51 = vperm.slane %v608_v43, %v619_v30  ;;  %v627_v54 = vperm.slane %v609_v46, %v619_v30 }
  0xcf   : > { %v629_v45 = vsel %vm628_vm0, %v621_v41, %v620_v40 }
  0xd0   : > { %v631_v48 = vsel %vm630_vm1, %v622_v42, %v629_v45 }
  0xd1   : > { %v633_v50 = vsel %vm632_vm2, %v623_v44, %v631_v48 }
  0xd2   : > { %v635_v52 = vsel %vm634_vm3, %v624_v47, %v633_v50 }
  0xd3   : > { %v637_v53 = vsel %vm636_vm4, %v625_v49, %v635_v52 }
  0xd4   : > { %v639_v55 = vsel %vm638_vm5, %v626_v51, %v637_v53 }
  0xd5   : > { %v641_v56 = vsel %vm640_vm6, %v627_v54, %v639_v55 }
  0xd6   : > { %644 = vst.msk [vmem:[#allocation5] sm:$0xff] %vm643_vm7, %v641_v56 }
  0xd7 PF: > { %v2317_v57 = vld [vmem:[#allocation2] sm:$0xff]  ;;  %vm676_vm8 = vcmask 64512   ;;  %v659_v5 = vld [vmem:[#allocation12] sm:$0xff]  ;;  %v660_v6 = vld [vmem:[#allocation12 + $0x8] sm:$0xff]  ;;  %s2344_s21 = sld [smem:[#allocation7 + %s2220_s0]]  ;;  %vm1009_vm9 = vcmask 1041409  }
  0xd8   : > { %v1778_v58 = vld [vmem:[%s2381_s6] ss:$0 sm:$0xff]  ;;  %713 = vmatpush.msra.mxu2 %v659_v5  ;;  %735 = vmatpush.msra.mxu3 %v660_v6  ;;  %v662_v8 = vld [vmem:[#allocation12 + $0x18] sm:$0xff]  ;;  %v996_v10 = vld [vmem:[#allocation18 + $0x1e0] sm:$0xff]  ;;  %vm1012_vm10 = vcmask 1042434   ;;  %vm1015_vm11 = vcmask 1043459  }
  0xd9   : > { %v671_v59 = vmul.f32 %v1778_v58, %v2317_v57  ;;  %v661_v7 = vld [vmem:[#allocation12 + $0x10] sm:$0xff]  ;;  %1030 = vmatpush.msra.mxu0 %v996_v10  ;;  %v992_v12 = vld [vmem:[#allocation18 + $0x1c0] sm:$0xff]  ;;  %v663_v18 = vld [vmem:[#allocation12 + $0x20] sm:$0xff]  ;;  %vm1018_vm12 = vcmask 1044484   ;;  %vm1021_vm13 = vcmask 1045509   ;;  %s1649_s20 = sshll.u32 %s2220_s0, 3 }
  0xda   : > { %757 = vmatpush.msrb.mxu2 %v661_v7  ;;  %779 = vmatpush.msrb.mxu3 %v662_v8  ;;  %v997_v11 = vld [vmem:[#allocation18 + $0x1e8] sm:$0xff]  ;;  %v988_v14 = vld [vmem:[#allocation18 + $0x1a0] sm:$0xff]  ;;  %v666_v34 = vld [vmem:[#allocation12 + $0x38] sm:$0xff]  ;;  %vm1024_vm14 = vcmask 1046534   ;;  %vm1027_vm15 = vcmask 1047559   ;;  %s648_s23 = scalar_lea.vmem [#allocation9], %s1649_s20 }
  0xdb   : > { %672 = vadd.xlane.f32.xlu0 %v671_v59  ;;  %1050 = vmatpush.msra.mxu1 %v997_v11  ;;  %v993_v13 = vld [vmem:[#allocation18 + $0x1c8] sm:$0xff]  ;;  %v984_v19 = vld [vmem:[#allocation18 + $0x180] sm:$0xff]  ;;  %v998_v42 = vld [vmem:[#allocation18 + $0x1f0] sm:$0xff]  ;;  %s1455_s29 = scalar_lea.vmem [#allocation23], %s1649_s20  ;;  %p1744_p7 = scmp.eq.s32.totalorder %s2220_s0, 4 }
  0xdc   : > { %1031 = vmatpush.msra.mxu0 %v992_v12  ;;  %v989_v16 = vld [vmem:[#allocation18 + $0x1a8] sm:$0xff]  ;;  %v664_v22 = vld [vmem:[#allocation12 + $0x28] sm:$0xff]  ;;  %v999_v46 = vld [vmem:[#allocation18 + $0x1f8] sm:$0xff]  ;;  %s2129_s24 = smov [#allocation23]   ;;  %s1515_s26 = sshll.u32 %s2388_s14, 4  ;;  %s1516_s26 = int_to_ptr.hbm [resolvable:$true] %s1515_s26 }
  0xdd   : > { %v674_v60 = vld [vmem:[#allocation5] sm:$0xff]  ;;  %1051 = vmatpush.msra.mxu1 %v993_v13  ;;  %v994_v47 = vld [vmem:[#allocation18 + $0x1d0] sm:$0xff]  ;;  %v995_v50 = vld [vmem:[#allocation18 + $0x1d8] sm:$0xff]  ;;  %s646_s27 = scvt.s32.f32 %s2344_s21  ;;  %s1513_s1 = sshll.u32 %s2129_s24, 4  ;;  %s1514_s1 = int_to_ptr.vmem [resolvable:$true] %s1513_s1 }
  0xde   : > { %1032 = vmatpush.msra.mxu0 %v988_v14  ;;  %v985_v20 = vld [vmem:[#allocation18 + $0x188] sm:$0xff]  ;;  %v980_v23 = vld [vmem:[#allocation18 + $0x160] sm:$0xff]  ;;  %v990_v51 = vld [vmem:[#allocation18 + $0x1b0] sm:$0xff]  ;;  %s2131_s3 = smov 128   ;;  %s2132_s22 = smov 8  }
  0xdf   : > { %1052 = vmatpush.msra.mxu1 %v989_v16  ;;  %v981_v24 = vld [vmem:[#allocation18 + $0x168] sm:$0xff]  ;;  %v976_v25 = vld [vmem:[#allocation18 + $0x140] sm:$0xff]  ;;  %v991_v54 = vld [vmem:[#allocation18 + $0x1b8] sm:$0xff]  ;;  %s652_s7 = ssub.f32 1.0, %s646_s27 }
  0xe0   : > { %1033 = vmatpush.msra.mxu0 %v984_v19  ;;  %v977_v26 = vld [vmem:[#allocation18 + $0x148] sm:$0xff]  ;;  %v972_v27 = vld [vmem:[#allocation18 + $0x120] sm:$0xff]  ;;  %v986_v55 = vld [vmem:[#allocation18 + $0x190] sm:$0xff] }
  0xe1   : > { %1053 = vmatpush.msra.mxu1 %v985_v20  ;;  %v973_v28 = vld [vmem:[#allocation18 + $0x128] sm:$0xff]  ;;  %v968_v31 = vld [vmem:[#allocation18 + $0x100] sm:$0xff]  ;;  %v987_v59 = vld [vmem:[#allocation18 + $0x198] sm:$0xff] }
  0xe2   : > { %1034 = vmatpush.msra.mxu0 %v980_v23  ;;  %v665_v30 = vld [vmem:[#allocation12 + $0x30] sm:$0xff]  ;;  %v964_v35 = vld [vmem:[#allocation18 + $0xe0] sm:$0xff]  ;;  %v975_v7 = vld [vmem:[#allocation18 + $0x138] sm:$0xff] }
  0xe3   : > { %1054 = vmatpush.msra.mxu1 %v981_v24  ;;  %v969_v32 = vld [vmem:[#allocation18 + $0x108] sm:$0xff]  ;;  %v960_v37 = vld [vmem:[#allocation18 + $0xc0] sm:$0xff]  ;;  %v970_v8 = vld [vmem:[#allocation18 + $0x110] sm:$0xff] }
  0xe4   : > { %1035 = vmatpush.msra.mxu0 %v976_v25  ;;  %v965_v36 = vld [vmem:[#allocation18 + $0xe8] sm:$0xff]  ;;  %v956_v39 = vld [vmem:[#allocation18 + $0xa0] sm:$0xff]  ;;  %v966_v10 = vld [vmem:[#allocation18 + $0xf0] sm:$0xff] }
  0xe5   : > { %1055 = vmatpush.msra.mxu1 %v977_v26  ;;  %v961_v38 = vld [vmem:[#allocation18 + $0xc8] sm:$0xff]  ;;  %v952_v43 = vld [vmem:[#allocation18 + $0x80] sm:$0xff]  ;;  %v967_v11 = vld [vmem:[#allocation18 + $0xf8] sm:$0xff] }
  0xe6   : > { %1036 = vmatpush.msra.mxu0 %v972_v27  ;;  %v957_v40 = vld [vmem:[#allocation18 + $0xa8] sm:$0xff]  ;;  %v948_v48 = vld [vmem:[#allocation18 + $0x60] sm:$0xff]  ;;  %v962_v12 = vld [vmem:[#allocation18 + $0xd0] sm:$0xff] }
  0xe7   : > { %1056 = vmatpush.msra.mxu1 %v973_v28  ;;  %v953_v44 = vld [vmem:[#allocation18 + $0x88] sm:$0xff]  ;;  %v944_v52 = vld [vmem:[#allocation18 + $0x40] sm:$0xff]  ;;  %v963_v13 = vld [vmem:[#allocation18 + $0xd8] sm:$0xff] }
  0xe8   : > { %1037 = vmatpush.msra.mxu0 %v968_v31  ;;  %v949_v49 = vld [vmem:[#allocation18 + $0x68] sm:$0xff]  ;;  %v940_v56 = vld [vmem:[#allocation18 + $0x20] sm:$0xff]  ;;  %v958_v14 = vld [vmem:[#allocation18 + $0xb0] sm:$0xff] }
  0xe9   : > { %1057 = vmatpush.msra.mxu1 %v969_v32  ;;  %v945_v53 = vld [vmem:[#allocation18 + $0x48] sm:$0xff]  ;;  %v932_v5 = vld [vmem:[#allocation17 + $0x1e0] sm:$0xff]  ;;  %v954_v16 = vld [vmem:[#allocation18 + $0x90] sm:$0xff] }
  0xea   : > { %1038 = vmatpush.msra.mxu0 %v964_v35  ;;  %v933_v6 = vld [vmem:[#allocation17 + $0x1e8] sm:$0xff]  ;;  %v951_v19 = vld [vmem:[#allocation18 + $0x78] sm:$0xff]  ;;  %v946_v20 = vld [vmem:[#allocation18 + $0x50] sm:$0xff] }
  0xeb   : > { %1058 = vmatpush.msra.mxu1 %v965_v36  ;;  %v943_v23 = vld [vmem:[#allocation18 + $0x38] sm:$0xff]  ;;  %v938_v24 = vld [vmem:[#allocation18 + $0x10] sm:$0xff]  ;;  %v928_v28 = vld [vmem:[#allocation17 + $0x1c0] sm:$0xff] }
  0xec   : > { %1039 = vmatpush.msra.mxu0 %v960_v37  ;;  %v934_v25 = vld [vmem:[#allocation17 + $0x1f0] sm:$0xff]  ;;  %v939_v26 = vld [vmem:[#allocation18 + $0x18] sm:$0xff]  ;;  %v924_v32 = vld [vmem:[#allocation17 + $0x1a0] sm:$0xff] }
  0xed   : > { %1059 = vmatpush.msra.mxu1 %v961_v38  ;;  %v935_v27 = vld [vmem:[#allocation17 + $0x1f8] sm:$0xff]  ;;  %v920_v36 = vld [vmem:[#allocation17 + $0x180] sm:$0xff]  ;;  %v921_v37 = vld [vmem:[#allocation17 + $0x188] sm:$0xff] }
  0xee   : > { %1040 = vmatpush.msra.mxu0 %v956_v39  ;;  %v931_v31 = vld [vmem:[#allocation17 + $0x1d8] sm:$0xff]  ;;  %v922_v38 = vld [vmem:[#allocation17 + $0x190] sm:$0xff] }
  0xef   : > { %1060 = vmatpush.msra.mxu1 %v957_v40  ;;  %v927_v35 = vld [vmem:[#allocation17 + $0x1b8] sm:$0xff]  ;;  %v916_v40 = vld [vmem:[#allocation17 + $0x160] sm:$0xff] }
  0xf0   : > { %1041 = vmatpush.msra.mxu0 %v952_v43  ;;  %v923_v39 = vld [vmem:[#allocation17 + $0x198] sm:$0xff] }
  0xf1   : > { %1061 = vmatpush.msra.mxu1 %v953_v44  ;;  %v919_v43 = vld [vmem:[#allocation17 + $0x178] sm:$0xff]  ;;  %v912_v44 = vld [vmem:[#allocation17 + $0x140] sm:$0xff] }
  0xf2   : > { %1042 = vmatpush.msra.mxu0 %v948_v48  ;;  %v908_v48 = vld [vmem:[#allocation17 + $0x120] sm:$0xff] }
  0xf3   : > { %1062 = vmatpush.msra.mxu1 %v949_v49  ;;  %v909_v49 = vld [vmem:[#allocation17 + $0x128] sm:$0xff] }
  0xf4   : > { %1043 = vmatpush.msra.mxu0 %v944_v52  ;;  %v904_v52 = vld [vmem:[#allocation17 + $0x100] sm:$0xff] }
  0xf5   : > { %1063 = vmatpush.msra.mxu1 %v945_v53  ;;  %v905_v53 = vld [vmem:[#allocation17 + $0x108] sm:$0xff] }
  0xf6   : > { %1044 = vmatpush.msra.mxu0 %v940_v56  ;;  %v900_v56 = vld [vmem:[#allocation17 + $0xe0] sm:$0xff] }
 0x14e   : > { %v673_v61 = vpop.xlane.xlu0 %672 }
 0x14f   : > { %v675_v62 = vadd.f32 %v674_v60, %v673_v61  ;;  %v982_v60 = vld [vmem:[#allocation18 + $0x170] sm:$0xff]  ;;  %v941_v61 = vld [vmem:[#allocation18 + $0x28] sm:$0xff] }
 0x150   : > { %1064 = vmatpush.msra.mxu1 %v941_v61  ;;  %v896_v61 = vld [vmem:[#allocation17 + $0xc0] sm:$0xff] }
 0x151   : > { %v677_v63 = vsel %vm676_vm8, %v675_v62, -inf }
 0x152   : > { %678 = vmax.xlane.f32.xlu0 %v677_v63  ;;  %v983_v63 = vld [vmem:[#allocation18 + $0x178] sm:$0xff] }
 0x1c5   : > { %v679_v0 = vpop.xlane.xlu0 %678 }
 0x1c6   : > { %v680_v1 = vsub.f32 %v675_v62, %v679_v0  ;;  %v978_v0 = vld [vmem:[#allocation18 + $0x150] sm:$0xff] }
 0x1c8   : > { %v681_v2 = vmul.f32 1.442695, %v680_v1  ;;  %v936_v1 = vld [vmem:[#allocation18] sm:$0xff] }
 0x1c9   : > { %1045 = vmatpush.msra.mxu0 %v936_v1  ;;  %v892_v1 = vld [vmem:[#allocation17 + $0xa0] sm:$0xff] }
 0x1ca   : > { %1780 = vpow2.f32 %v681_v2  ;;  %v937_v2 = vld [vmem:[#allocation18 + $0x8] sm:$0xff] }
 0x1cb   : > { %1065 = vmatpush.msra.mxu1 %v937_v2  ;;  %1110 = vmatpush.msrb.mxu0 %v932_v5  ;;  %v893_v2 = vld [vmem:[#allocation17 + $0xa8] sm:$0xff]  ;;  %v888_v5 = vld [vmem:[#allocation17 + $0x80] sm:$0xff] }
 0x1cd   : > { %1130 = vmatpush.msrb.mxu1 %v933_v6  ;;  %1111 = vmatpush.msrb.mxu0 %v928_v28  ;;  %v889_v6 = vld [vmem:[#allocation17 + $0x88] sm:$0xff] }
 0x1cf   : > { %1112 = vmatpush.msrb.mxu0 %v924_v32 }
 0x1d0   : > { %v1781_v3 = vpop.eup %1780 }
 0x1d1   : > { %v683_v4 = vsel %vm676_vm8, %v1781_v3, 0.0  ;;  %1113 = vmatpush.msrb.mxu0 %v920_v36 }
 0x1d2   : > { %684 = vadd.xlane.f32.xlu1 %v683_v4  ;;  %v974_v4 = vld [vmem:[#allocation18 + $0x130] sm:$0xff] }
 0x1d3   : > { %1114 = vmatpush.msrb.mxu0 %v916_v40 }
 0x1d5   : > { %1115 = vmatpush.msrb.mxu0 %v912_v44 }
 0x1d7   : > { %1116 = vmatpush.msrb.mxu0 %v908_v48  ;;  %v1251_v48 = vld [vmem:[#allocation20 + $0x1e8] sm:$0xff] }
 0x1d9   : > { %1117 = vmatpush.msrb.mxu0 %v904_v52  ;;  %v654_v52 = vstv %s652_s7 }
 0x1db   : > { %1118 = vmatpush.msrb.mxu0 %v900_v56  ;;  %v1247_v56 = vld [vmem:[#allocation20 + $0x1c8] sm:$0xff] }
 0x1dd   : > { %1119 = vmatpush.msrb.mxu0 %v896_v61 }
 0x1df   : > { %1120 = vmatpush.msrb.mxu0 %v892_v1  ;;  %v1245_v1 = vld [vmem:[#allocation20 + $0x1b8] sm:$0xff] }
 0x1e1   : > { %1121 = vmatpush.msrb.mxu0 %v888_v5  ;;  %v1241_v5 = vld [vmem:[#allocation20 + $0x198] sm:$0xff] }
 0x245   : > { %v685_v9 = vpop.xlane.xlu1 %684 }
 0x246   : > { %1782 = vrcp.f32 %v685_v9  ;;  %v971_v9 = vld [vmem:[#allocation18 + $0x118] sm:$0xff] }
 0x24c   : > { %v1783_v15 = vpop.eup %1782 }
 0x24d   : > { %v2325_v17 = vmul.f32 %v1783_v15, %v1781_v3  ;;  %v979_v3 = vld [vmem:[#allocation18 + $0x158] sm:$0xff] }
 0x24e   : > { %v959_v15 = vld [vmem:[#allocation18 + $0xb8] sm:$0xff] }
 0x24f   : > { %1650 = vmatmul.msk.f32.vlgmr.msra.gmra.mxu2 %vm676_vm8, %v2325_v17  ;;  %v689_v21 = vrot.slane %v2325_v17, 1  ;;  %v690_v29 = vrot.slane %v2325_v17, 2  ;;  %v691_v33 = vrot.slane %v2325_v17, 3  ;;  %v692_v41 = vrot.slane %v2325_v17, 4 }
 0x250   : > { %801 = vmatpush.msra.mxu2 %v663_v18  ;;  %v693_v45 = vrot.slane %v2325_v17, 5  ;;  %v694_v58 = vrot.slane %v2325_v17, 6  ;;  %v695_v62 = vrot.slane %v2325_v17, 7  ;;  %v955_v17 = vld [vmem:[#allocation18 + $0x98] sm:$0xff]  ;;  %v950_v18 = vld [vmem:[#allocation18 + $0x70] sm:$0xff] }
 0x251   : > { %1651 = vmatmul.msk.f32.vlgmr.msra.gmra.mxu3 %vm676_vm8, %v689_v21  ;;  %v947_v21 = vld [vmem:[#allocation18 + $0x58] sm:$0xff] }
 0x252   : > { %823 = vmatpush.msra.mxu3 %v664_v22  ;;  %v942_v22 = vld [vmem:[#allocation18 + $0x30] sm:$0xff] }
 0x257   : > { %1652 = vmatmul.msk.f32.vlgmr.msrb.gmra.mxu2 %vm676_vm8, %v690_v29  ;;  %v929_v29 = vld [vmem:[#allocation17 + $0x1c8] sm:$0xff] }
 0x258   : > { %845 = vmatpush.msrb.mxu2 %v665_v30  ;;  %v930_v30 = vld [vmem:[#allocation17 + $0x1d0] sm:$0xff]  ;;  %1131 = vmatpush.msrb.mxu1 %v929_v29 }
 0x259   : > { %1653 = vmatmul.msk.f32.vlgmr.msrb.gmra.mxu3 %vm676_vm8, %v691_v33  ;;  %v925_v33 = vld [vmem:[#allocation17 + $0x1a8] sm:$0xff] }
 0x25a   : > { %867 = vmatpush.msrb.mxu3 %v666_v34  ;;  %v926_v34 = vld [vmem:[#allocation17 + $0x1b0] sm:$0xff]  ;;  %1132 = vmatpush.msrb.mxu1 %v925_v33 }
 0x25c   : > { %1133 = vmatpush.msrb.mxu1 %v921_v37 }
 0x25f   : > { %1654 = vmatmul.msk.f32.vlgmr.msra.gmra.mxu2 %vm676_vm8, %v692_v41  ;;  %v917_v41 = vld [vmem:[#allocation17 + $0x168] sm:$0xff] }
 0x260   : > { %1070 = vmatpush.msra.mxu2 %v998_v42  ;;  %v918_v42 = vld [vmem:[#allocation17 + $0x170] sm:$0xff]  ;;  %1134 = vmatpush.msrb.mxu1 %v917_v41 }
 0x261   : > { %1655 = vmatmul.msk.f32.vlgmr.msra.gmra.mxu3 %vm676_vm8, %v693_v45  ;;  %v913_v45 = vld [vmem:[#allocation17 + $0x148] sm:$0xff] }
 0x262   : > { %1090 = vmatpush.msra.mxu3 %v999_v46  ;;  %1071 = vmatpush.msra.mxu2 %v994_v47  ;;  %v914_v46 = vld [vmem:[#allocation17 + $0x150] sm:$0xff]  ;;  %v915_v47 = vld [vmem:[#allocation17 + $0x158] sm:$0xff] }
 0x263   : > { %1135 = vmatpush.msrb.mxu1 %v913_v45 }
 0x264   : > { %1091 = vmatpush.msra.mxu3 %v995_v50  ;;  %1072 = vmatpush.msra.mxu2 %v990_v51  ;;  %v910_v50 = vld [vmem:[#allocation17 + $0x130] sm:$0xff]  ;;  %v911_v51 = vld [vmem:[#allocation17 + $0x138] sm:$0xff] }
 0x265   : > { %1136 = vmatpush.msrb.mxu1 %v909_v49  ;;  %v649_v49 = vld [vmem:[%s648_s23] sm:$0xff] }
 0x266   : > { %1092 = vmatpush.msra.mxu3 %v991_v54  ;;  %1073 = vmatpush.msra.mxu2 %v986_v55  ;;  %v906_v54 = vld [vmem:[#allocation17 + $0x110] sm:$0xff]  ;;  %v907_v55 = vld [vmem:[#allocation17 + $0x118] sm:$0xff] }
 0x267   : > { %1656 = vmatmul.msk.f32.vlgmr.msrb.gmra.mxu2 %vm676_vm8, %v694_v58  ;;  %1137 = vmatpush.msrb.mxu1 %v905_v53  ;;  %v901_v58 = vld [vmem:[#allocation17 + $0xe8] sm:$0xff]  ;;  %v1252_v53 = vld [vmem:[#allocation20 + $0x1f0] sm:$0xff] }
 0x268   : > { %1093 = vmatpush.msra.mxu3 %v987_v59  ;;  %1074 = vmatpush.msra.mxu2 %v982_v60  ;;  %v902_v59 = vld [vmem:[#allocation17 + $0xf0] sm:$0xff]  ;;  %v903_v60 = vld [vmem:[#allocation17 + $0xf8] sm:$0xff] }
 0x269   : > { %1657 = vmatmul.msk.f32.vlgmr.msrb.gmra.mxu3 %vm676_vm8, %v695_v62  ;;  %1138 = vmatpush.msrb.mxu1 %v901_v58  ;;  %v897_v62 = vld [vmem:[#allocation17 + $0xc8] sm:$0xff]  ;;  %v1248_v58 = vld [vmem:[#allocation20 + $0x1d0] sm:$0xff] }
 0x26a   : > { %1094 = vmatpush.msra.mxu3 %v983_v63  ;;  %1075 = vmatpush.msra.mxu2 %v978_v0  ;;  %v898_v63 = vld [vmem:[#allocation17 + $0xd0] sm:$0xff]  ;;  %v899_v0 = vld [vmem:[#allocation17 + $0xd8] sm:$0xff] }
 0x26b   : > { %1139 = vmatpush.msrb.mxu1 %v897_v62  ;;  %v1242_v62 = vld [vmem:[#allocation20 + $0x1a0] sm:$0xff] }
 0x26c   : > { %1095 = vmatpush.msra.mxu3 %v979_v3  ;;  %1076 = vmatpush.msra.mxu2 %v974_v4  ;;  %v894_v3 = vld [vmem:[#allocation17 + $0xb0] sm:$0xff]  ;;  %v895_v4 = vld [vmem:[#allocation17 + $0xb8] sm:$0xff] }
 0x26d   : > { %1140 = vmatpush.msrb.mxu1 %v893_v2  ;;  %v1238_v2 = vld [vmem:[#allocation20 + $0x180] sm:$0xff] }
 0x26e   : > { %1096 = vmatpush.msra.mxu3 %v975_v7  ;;  %1077 = vmatpush.msra.mxu2 %v970_v8  ;;  %v890_v7 = vld [vmem:[#allocation17 + $0x90] sm:$0xff]  ;;  %v891_v8 = vld [vmem:[#allocation17 + $0x98] sm:$0xff] }
 0x26f   : > { %1141 = vmatpush.msrb.mxu1 %v889_v6 }
 0x270   : > { %1097 = vmatpush.msra.mxu3 %v971_v9  ;;  %1078 = vmatpush.msra.mxu2 %v966_v10  ;;  %v884_v9 = vld [vmem:[#allocation17 + $0x60] sm:$0xff]  ;;  %v885_v10 = vld [vmem:[#allocation17 + $0x68] sm:$0xff] }
 0x271   : > { %1122 = vmatpush.msrb.mxu0 %v884_v9  ;;  %1142 = vmatpush.msrb.mxu1 %v885_v10  ;;  %v1236_v9 = vld [vmem:[#allocation20 + $0x170] sm:$0xff]  ;;  %v1237_v10 = vld [vmem:[#allocation20 + $0x178] sm:$0xff] }
 0x272   : > { %1098 = vmatpush.msra.mxu3 %v967_v11  ;;  %1079 = vmatpush.msra.mxu2 %v962_v12  ;;  %v886_v11 = vld [vmem:[#allocation17 + $0x70] sm:$0xff]  ;;  %v887_v12 = vld [vmem:[#allocation17 + $0x78] sm:$0xff] }
 0x274   : > { %1099 = vmatpush.msra.mxu3 %v963_v13  ;;  %1080 = vmatpush.msra.mxu2 %v958_v14  ;;  %v880_v13 = vld [vmem:[#allocation17 + $0x40] sm:$0xff]  ;;  %v881_v14 = vld [vmem:[#allocation17 + $0x48] sm:$0xff] }
 0x275   : > { %1123 = vmatpush.msrb.mxu0 %v880_v13  ;;  %1143 = vmatpush.msrb.mxu1 %v881_v14  ;;  %v1232_v13 = vld [vmem:[#allocation20 + $0x150] sm:$0xff]  ;;  %v1233_v14 = vld [vmem:[#allocation20 + $0x158] sm:$0xff] }
 0x276   : > { %1100 = vmatpush.msra.mxu3 %v959_v15  ;;  %1081 = vmatpush.msra.mxu2 %v954_v16  ;;  %v882_v15 = vld [vmem:[#allocation17 + $0x50] sm:$0xff]  ;;  %v883_v16 = vld [vmem:[#allocation17 + $0x58] sm:$0xff] }
 0x278   : > { %1101 = vmatpush.msra.mxu3 %v955_v17  ;;  %1082 = vmatpush.msra.mxu2 %v950_v18  ;;  %v876_v17 = vld [vmem:[#allocation17 + $0x20] sm:$0xff]  ;;  %v877_v18 = vld [vmem:[#allocation17 + $0x28] sm:$0xff] }
 0x279   : > { %1124 = vmatpush.msrb.mxu0 %v876_v17  ;;  %1144 = vmatpush.msrb.mxu1 %v877_v18  ;;  %v1228_v17 = vld [vmem:[#allocation20 + $0x130] sm:$0xff]  ;;  %v1229_v18 = vld [vmem:[#allocation20 + $0x138] sm:$0xff] }
 0x27a   : > { %1102 = vmatpush.msra.mxu3 %v951_v19  ;;  %1083 = vmatpush.msra.mxu2 %v946_v20  ;;  %v878_v19 = vld [vmem:[#allocation17 + $0x30] sm:$0xff]  ;;  %v879_v20 = vld [vmem:[#allocation17 + $0x38] sm:$0xff] }
 0x27c   : > { %1103 = vmatpush.msra.mxu3 %v947_v21  ;;  %1084 = vmatpush.msra.mxu2 %v942_v22  ;;  %v872_v21 = vld [vmem:[#allocation17] sm:$0xff]  ;;  %v873_v22 = vld [vmem:[#allocation17 + $0x8] sm:$0xff] }
 0x27d   : > { %1125 = vmatpush.msrb.mxu0 %v872_v21  ;;  %1145 = vmatpush.msrb.mxu1 %v873_v22  ;;  %v1224_v21 = vld [vmem:[#allocation20 + $0x110] sm:$0xff]  ;;  %v1225_v22 = vld [vmem:[#allocation20 + $0x118] sm:$0xff] }
 0x27e   : > { %1104 = vmatpush.msra.mxu3 %v943_v23  ;;  %1085 = vmatpush.msra.mxu2 %v938_v24  ;;  %v874_v23 = vld [vmem:[#allocation17 + $0x10] sm:$0xff]  ;;  %v875_v24 = vld [vmem:[#allocation17 + $0x18] sm:$0xff] }
 0x280   : > { %1150 = vmatpush.msrb.mxu2 %v934_v25  ;;  %1105 = vmatpush.msra.mxu3 %v939_v26 }
 0x282   : > { %1170 = vmatpush.msrb.mxu3 %v935_v27  ;;  %1151 = vmatpush.msrb.mxu2 %v930_v30 }
 0x284   : > { %1171 = vmatpush.msrb.mxu3 %v931_v31  ;;  %1152 = vmatpush.msrb.mxu2 %v926_v34 }
 0x286   : > { %1172 = vmatpush.msrb.mxu3 %v927_v35  ;;  %1153 = vmatpush.msrb.mxu2 %v922_v38 }
 0x288   : > { %1173 = vmatpush.msrb.mxu3 %v923_v39  ;;  %1154 = vmatpush.msrb.mxu2 %v918_v42 }
 0x28a   : > { %1174 = vmatpush.msrb.mxu3 %v919_v43  ;;  %1155 = vmatpush.msrb.mxu2 %v914_v46  ;;  %v1250_v46 = vld [vmem:[#allocation20 + $0x1e0] sm:$0xff] }
 0x28c   : > { %1175 = vmatpush.msrb.mxu3 %v915_v47  ;;  %1156 = vmatpush.msrb.mxu2 %v910_v50  ;;  %v650_v50 = vstv %s646_s27 }
 0x28e   : > { %1176 = vmatpush.msrb.mxu3 %v911_v51  ;;  %1157 = vmatpush.msrb.mxu2 %v906_v54  ;;  %v653_v51 = vld [vmem:[#allocation4] sm:$0xff] }
 0x28f   : > { %v1253_v54 = vld [vmem:[#allocation20 + $0x1f8] sm:$0xff]  ;;  %v655_v61 = vmul.f32 %v654_v52, %v653_v51  ;;  %v1190_v51 = vld [vmem:[#allocation20] sm:$0xff]  ;;  %v1191_v52 = vld [vmem:[#allocation20 + $0x8] sm:$0xff] }
 0x290   : > { %1177 = vmatpush.msrb.mxu3 %v907_v55  ;;  %1158 = vmatpush.msrb.mxu2 %v902_v59  ;;  %v1246_v55 = vld [vmem:[#allocation20 + $0x1c0] sm:$0xff]  ;;  %v1249_v59 = vld [vmem:[#allocation20 + $0x1d8] sm:$0xff] }
 0x292   : > { %1178 = vmatpush.msrb.mxu3 %v903_v60  ;;  %1159 = vmatpush.msrb.mxu2 %v898_v63  ;;  %v651_v60 = vmul.f32 %v650_v50, %v649_v49  ;;  %v1243_v63 = vld [vmem:[#allocation20 + $0x1a8] sm:$0xff]  ;;  %v1196_v49 = vld [vmem:[#allocation20 + $0x30] sm:$0xff]  ;;  %v1197_v50 = vld [vmem:[#allocation20 + $0x38] sm:$0xff] }
 0x294   : > { %1179 = vmatpush.msrb.mxu3 %v899_v0  ;;  %1160 = vmatpush.msrb.mxu2 %v894_v3  ;;  %v1244_v0 = vld [vmem:[#allocation20 + $0x1b0] sm:$0xff]  ;;  %v1239_v3 = vld [vmem:[#allocation20 + $0x188] sm:$0xff]  ;;  %v656_v6 = vadd.f32 %v655_v61, %v651_v60 }
 0x295   : > { %v1428_v60 = vld [vmem:[#allocation21 + $0x68] sm:$0xff] }
 0x296   : > { %1180 = vmatpush.msrb.mxu3 %v895_v4  ;;  %1161 = vmatpush.msrb.mxu2 %v890_v7  ;;  %v1240_v4 = vld [vmem:[#allocation20 + $0x190] sm:$0xff]  ;;  %v1234_v7 = vld [vmem:[#allocation20 + $0x160] sm:$0xff] }
 0x298   : > { %1181 = vmatpush.msrb.mxu3 %v891_v8  ;;  %1162 = vmatpush.msrb.mxu2 %v886_v11  ;;  %v1235_v8 = vld [vmem:[#allocation20 + $0x168] sm:$0xff]  ;;  %v1230_v11 = vld [vmem:[#allocation20 + $0x140] sm:$0xff] }
 0x29a   : > { %1182 = vmatpush.msrb.mxu3 %v887_v12  ;;  %1163 = vmatpush.msrb.mxu2 %v882_v15  ;;  %v1231_v12 = vld [vmem:[#allocation20 + $0x148] sm:$0xff]  ;;  %v1226_v15 = vld [vmem:[#allocation20 + $0x120] sm:$0xff] }
 0x29c   : > { %1183 = vmatpush.msrb.mxu3 %v883_v16  ;;  %1164 = vmatpush.msrb.mxu2 %v878_v19  ;;  %v1227_v16 = vld [vmem:[#allocation20 + $0x128] sm:$0xff]  ;;  %v1222_v19 = vld [vmem:[#allocation20 + $0x100] sm:$0xff] }
 0x29e   : > { %1184 = vmatpush.msrb.mxu3 %v879_v20  ;;  %1165 = vmatpush.msrb.mxu2 %v874_v23  ;;  %v1223_v20 = vld [vmem:[#allocation20 + $0x108] sm:$0xff]  ;;  %v1218_v23 = vld [vmem:[#allocation20 + $0xe0] sm:$0xff] }
 0x2a0   : > { %1185 = vmatpush.msrb.mxu3 %v875_v24  ;;  %v1219_v24 = vld [vmem:[#allocation20 + $0xe8] sm:$0xff] }
 0x2d2   : > { %v715_v25 = vpop.f32.mrf.mxu2 }
 0x2d4   : > { %v737_v26 = vpop.f32.mrf.mxu3 }
 0x2d5   : > { %v1008_v29 = vrot.slane %v737_v26, 7  ;;  %v1221_v26 = vld [vmem:[#allocation20 + $0xf8] sm:$0xff] }
 0x2d7   : > { %v1010_v32 = vsel %vm1009_vm9, %v1008_v29, %v715_v25  ;;  %v1220_v25 = vld [vmem:[#allocation20 + $0xf0] sm:$0xff] }
 0x2d8   : > { %v1216_v29 = vld [vmem:[#allocation20 + $0xd0] sm:$0xff] }
 0x2da   : > { %v759_v27 = vpop.f32.mrf.mxu2 }
 0x2db   : > { %v1011_v30 = vrot.slane %v759_v27, 6  ;;  %v1214_v27 = vld [vmem:[#allocation20 + $0xc0] sm:$0xff] }
 0x2dc   : > { %v781_v28 = vpop.f32.mrf.mxu3 }
 0x2dd   : > { %v1014_v33 = vrot.slane %v781_v28, 5  ;;  %v1013_v35 = vsel %vm1012_vm10, %v1011_v30, %v1010_v32  ;;  %v1215_v28 = vld [vmem:[#allocation20 + $0xc8] sm:$0xff]  ;;  %v1217_v30 = vld [vmem:[#allocation20 + $0xd8] sm:$0xff] }
 0x2de   : > { %v1211_v32 = vld [vmem:[#allocation20 + $0xa8] sm:$0xff] }
 0x2df   : > { %v1016_v37 = vsel %vm1015_vm11, %v1014_v33, %v1013_v35  ;;  %v1212_v33 = vld [vmem:[#allocation20 + $0xb0] sm:$0xff]  ;;  %v1206_v35 = vld [vmem:[#allocation20 + $0x80] sm:$0xff] }
 0x2e2   : > { %v803_v31 = vpop.f32.mrf.mxu2 }
 0x2e3   : > { %v1017_v36 = vrot.slane %v803_v31, 4  ;;  %v1210_v31 = vld [vmem:[#allocation20 + $0xa0] sm:$0xff] }
 0x2e4   : > { %v825_v34 = vpop.f32.mrf.mxu3 }
 0x2e5   : > { %v1020_v38 = vrot.slane %v825_v34, 3  ;;  %v1019_v39 = vsel %vm1018_vm12, %v1017_v36, %v1016_v37  ;;  %v1213_v34 = vld [vmem:[#allocation20 + $0xb8] sm:$0xff]  ;;  %v1207_v36 = vld [vmem:[#allocation20 + $0x88] sm:$0xff]  ;;  %v1208_v37 = vld [vmem:[#allocation20 + $0x90] sm:$0xff] }
 0x2e7   : > { %v1022_v42 = vsel %vm1021_vm13, %v1020_v38, %v1019_v39  ;;  %v1209_v38 = vld [vmem:[#allocation20 + $0x98] sm:$0xff]  ;;  %v1202_v39 = vld [vmem:[#allocation20 + $0x60] sm:$0xff] }
 0x2ea   : > { %v847_v40 = vpop.f32.mrf.mxu2 }
 0x2eb   : > { %v1023_v41 = vrot.slane %v847_v40, 2  ;;  %v1203_v40 = vld [vmem:[#allocation20 + $0x68] sm:$0xff] }
 0x2ec   : > { %v869_v43 = vpop.f32.mrf.mxu3 }
 0x2ed   : > { %v1025_v44 = vsel %vm1024_vm14, %v1023_v41, %v1022_v42  ;;  %v1026_v45 = vrot.slane %v869_v43, 1  ;;  %v1204_v41 = vld [vmem:[#allocation20 + $0x70] sm:$0xff]  ;;  %v1205_v42 = vld [vmem:[#allocation20 + $0x78] sm:$0xff]  ;;  %v1198_v43 = vld [vmem:[#allocation20 + $0x40] sm:$0xff] }
 0x2ef   : > { %v1028_v47 = vsel %vm1027_vm15, %v1026_v45, %v1025_v44  ;;  %v1199_v44 = vld [vmem:[#allocation20 + $0x48] sm:$0xff]  ;;  %v1200_v45 = vld [vmem:[#allocation20 + $0x50] sm:$0xff] }
 0x2f0   : > { %1046 = vmatmul.f32.vlgmr.msra.gmra.mxu0 %v1028_v47  ;;  %1066 = vmatmul.f32.vlgmr.msra.gmra.mxu1 %v1028_v47 }
 0x2f1   : > { %1086 = vmatmul.f32.vlgmr.msra.gmra.mxu2 %v1028_v47  ;;  %1106 = vmatmul.f32.vlgmr.msra.gmra.mxu3 %v1028_v47  ;;  %v1194_v47 = vld [vmem:[#allocation20 + $0x20] sm:$0xff] }
 0x2f2   : > { %1254 = vmatpush.msra.mxu0 %v1250_v46  ;;  %1274 = vmatpush.msra.mxu1 %v1251_v48  ;;  %v1201_v46 = vld [vmem:[#allocation20 + $0x58] sm:$0xff]  ;;  %v1195_v48 = vld [vmem:[#allocation20 + $0x28] sm:$0xff] }
 0x2f3   : > { %1294 = vmatpush.msra.mxu2 %v1252_v53  ;;  %1314 = vmatpush.msra.mxu3 %v1253_v54  ;;  %v1192_v53 = vld [vmem:[#allocation20 + $0x10] sm:$0xff]  ;;  %v1193_v54 = vld [vmem:[#allocation20 + $0x18] sm:$0xff] }
 0x2f4   : > { %1255 = vmatpush.msra.mxu0 %v1246_v55  ;;  %1275 = vmatpush.msra.mxu1 %v1247_v56 }
 0x2f5   : > { %1295 = vmatpush.msra.mxu2 %v1248_v58  ;;  %1315 = vmatpush.msra.mxu3 %v1249_v59  ;;  %v1430_v58 = vld [vmem:[#allocation21 + $0x78] sm:$0xff]  ;;  %v1429_v59 = vld [vmem:[#allocation21 + $0x70] sm:$0xff] }
 0x2f6   : > { %1256 = vmatpush.msra.mxu0 %v1242_v62  ;;  %1276 = vmatpush.msra.mxu1 %v1243_v63  ;;  %v1427_v62 = vld [vmem:[#allocation21 + $0x60] sm:$0xff]  ;;  %v1426_v63 = vld [vmem:[#allocation21 + $0x58] sm:$0xff] }
 0x2f7   : > { %1296 = vmatpush.msra.mxu2 %v1244_v0  ;;  %1316 = vmatpush.msra.mxu3 %v1245_v1 }
 0x2f8   : > { %1257 = vmatpush.msra.mxu0 %v1238_v2  ;;  %1277 = vmatpush.msra.mxu1 %v1239_v3  ;;  %v1425_v2 = vld [vmem:[#allocation21 + $0x50] sm:$0xff]  ;;  %v1424_v3 = vld [vmem:[#allocation21 + $0x48] sm:$0xff] }
 0x2f9   : > { %1297 = vmatpush.msra.mxu2 %v1240_v4  ;;  %1317 = vmatpush.msra.mxu3 %v1241_v5  ;;  %v1423_v5 = vld [vmem:[#allocation21 + $0x40] sm:$0xff] }
 0x2fa   : > { %1126 = vmatmul.f32.vlgmr.msrb.gmra.mxu0 %v656_v6  ;;  %1146 = vmatmul.f32.vlgmr.msrb.gmra.mxu1 %v656_v6 }
 0x2fb   : > { %1166 = vmatmul.f32.vlgmr.msrb.gmra.mxu2 %v656_v6  ;;  %1186 = vmatmul.f32.vlgmr.msrb.gmra.mxu3 %v656_v6 }
 0x2fc   : > { %1258 = vmatpush.msra.mxu0 %v1234_v7  ;;  %1278 = vmatpush.msra.mxu1 %v1235_v8 }
 0x2fd   : > { %1298 = vmatpush.msra.mxu2 %v1236_v9  ;;  %1318 = vmatpush.msra.mxu3 %v1237_v10 }
 0x2fe   : > { %1259 = vmatpush.msra.mxu0 %v1230_v11  ;;  %1279 = vmatpush.msra.mxu1 %v1231_v12  ;;  %v1422_v11 = vld [vmem:[#allocation21 + $0x38] sm:$0xff] }
 0x2ff   : > { %1299 = vmatpush.msra.mxu2 %v1232_v13  ;;  %1319 = vmatpush.msra.mxu3 %v1233_v14 }
 0x300   : > { %1260 = vmatpush.msra.mxu0 %v1226_v15  ;;  %1280 = vmatpush.msra.mxu1 %v1227_v16  ;;  %v1421_v16 = vld [vmem:[#allocation21 + $0x30] sm:$0xff] }
 0x301   : > { %1300 = vmatpush.msra.mxu2 %v1228_v17  ;;  %1320 = vmatpush.msra.mxu3 %v1229_v18 }
 0x302   : > { %1261 = vmatpush.msra.mxu0 %v1222_v19  ;;  %1281 = vmatpush.msra.mxu1 %v1223_v20  ;;  %v1420_v19 = vld [vmem:[#allocation21 + $0x28] sm:$0xff] }
 0x303   : > { %1301 = vmatpush.msra.mxu2 %v1224_v21  ;;  %1321 = vmatpush.msra.mxu3 %v1225_v22  ;;  %v1419_v22 = vld [vmem:[#allocation21 + $0x20] sm:$0xff] }
 0x304   : > { %1262 = vmatpush.msra.mxu0 %v1218_v23  ;;  %1282 = vmatpush.msra.mxu1 %v1219_v24 }
 0x305   : > { %1302 = vmatpush.msra.mxu2 %v1220_v25  ;;  %1322 = vmatpush.msra.mxu3 %v1221_v26  ;;  %v1418_v25 = vld [vmem:[#allocation21 + $0x18] sm:$0xff] }
 0x306   : > { %1263 = vmatpush.msra.mxu0 %v1214_v27  ;;  %1283 = vmatpush.msra.mxu1 %v1215_v28  ;;  %v1417_v28 = vld [vmem:[#allocation21 + $0x10] sm:$0xff] }
 0x307   : > { %1303 = vmatpush.msra.mxu2 %v1216_v29  ;;  %1323 = vmatpush.msra.mxu3 %v1217_v30  ;;  %v1416_v30 = vld [vmem:[#allocation21 + $0x8] sm:$0xff] }
 0x308   : > { %1264 = vmatpush.msra.mxu0 %v1210_v31  ;;  %1284 = vmatpush.msra.mxu1 %v1211_v32  ;;  %v1415_v32 = vld [vmem:[#allocation21] sm:$0xff] }
 0x309   : > { %1304 = vmatpush.msra.mxu2 %v1212_v33  ;;  %1324 = vmatpush.msra.mxu3 %v1213_v34 }
 0x30a   : > { %1265 = vmatpush.msra.mxu0 %v1206_v35  ;;  %1285 = vmatpush.msra.mxu1 %v1207_v36 }
 0x30b   : > { %1305 = vmatpush.msra.mxu2 %v1208_v37  ;;  %1325 = vmatpush.msra.mxu3 %v1209_v38 }
 0x30c   : > { %1266 = vmatpush.msra.mxu0 %v1202_v39  ;;  %1286 = vmatpush.msra.mxu1 %v1203_v40 }
 0x30d   : > { %1306 = vmatpush.msra.mxu2 %v1204_v41  ;;  %1326 = vmatpush.msra.mxu3 %v1205_v42 }
 0x30e   : > { %1267 = vmatpush.msra.mxu0 %v1198_v43  ;;  %1287 = vmatpush.msra.mxu1 %v1199_v44 }
 0x30f   : > { %1307 = vmatpush.msra.mxu2 %v1200_v45  ;;  %1327 = vmatpush.msra.mxu3 %v1201_v46 }
 0x310   : > { %1268 = vmatpush.msra.mxu0 %v1194_v47  ;;  %1288 = vmatpush.msra.mxu1 %v1195_v48 }
 0x311   : > { %1308 = vmatpush.msra.mxu2 %v1196_v49  ;;  %1328 = vmatpush.msra.mxu3 %v1197_v50 }
 0x312   : > { %1269 = vmatpush.msra.mxu0 %v1190_v51  ;;  %1289 = vmatpush.msra.mxu1 %v1191_v52 }
 0x313   : > { %1309 = vmatpush.msra.mxu2 %v1192_v53  ;;  %1329 = vmatpush.msra.mxu3 %v1193_v54 }
 0x314   : > { %1270 = vmatmul.f32.vlgmr.msra.gmra.mxu0 %v2317_v57  ;;  %1290 = vmatmul.f32.vlgmr.msra.gmra.mxu1 %v2317_v57 }
 0x315   : > { %1310 = vmatmul.f32.vlgmr.msra.gmra.mxu2 %v2317_v57  ;;  %1330 = vmatmul.f32.vlgmr.msra.gmra.mxu3 %v2317_v57  ;;  %v1338_v57 = vld [vmem:[%s2385_s11] sm:$0xf] }
 0x316   : > { %1435 = vmatpush.msrb.mxu0 %v1430_v58  ;;  %v1340_v9 = vperm.slane %v1338_v57, 0  ;;  %v1341_v10 = vperm.slane %v1338_v57, 1  ;;  %v1343_v24 = vperm.slane %v1338_v57, 3  ;;  %v1342_v41 = vperm.slane %v1338_v57, 2 }
 0x318   : > { %1436 = vmatpush.msrb.mxu0 %v1429_v59 }
 0x31a   : > { %1437 = vmatpush.msrb.mxu0 %v1428_v60 }
 0x31c   : > { %1438 = vmatpush.msrb.mxu0 %v1427_v62 }
 0x31e   : > { %1439 = vmatpush.msrb.mxu0 %v1426_v63 }
 0x320   : > { %1440 = vmatpush.msrb.mxu0 %v1425_v2 }
 0x322   : > { %1441 = vmatpush.msrb.mxu0 %v1424_v3 }
 0x324   : > { %1442 = vmatpush.msrb.mxu0 %v1423_v5 }
 0x326   : > { %1443 = vmatpush.msrb.mxu0 %v1422_v11 }
 0x328   : > { %1444 = vmatpush.msrb.mxu0 %v1421_v16 }
 0x32a   : > { %1445 = vmatpush.msrb.mxu0 %v1420_v19 }
 0x32c   : > { %1446 = vmatpush.msrb.mxu0 %v1419_v22  ;;  %v1485_v22 = vld [vmem:[#allocation15 + $0x70] sm:$0xff] }
 0x32e   : > { %1447 = vmatpush.msrb.mxu0 %v1418_v25  ;;  %v1482_v25 = vld [vmem:[#allocation15 + $0x58] sm:$0xff] }
 0x330   : > { %1448 = vmatpush.msrb.mxu0 %v1417_v28  ;;  %v1479_v28 = vld [vmem:[#allocation15 + $0x40] sm:$0xff] }
 0x332   : > { %1449 = vmatpush.msrb.mxu0 %v1416_v30  ;;  %v1477_v30 = vld [vmem:[#allocation15 + $0x30] sm:$0xff] }
 0x334   : > { %1450 = vmatpush.msrb.mxu0 %v1415_v32  ;;  %v1459_v32 = vlaneseq }
 0x36d   : > { %v1047_v55 = vpop.f32.mrf.mxu0  ;;  %v1067_v56 = vpop.f32.mrf.mxu1 }
 0x374   : > { %v1107_v61 = vpop.f32.mrf.mxu3  ;;  %v1087_v4 = vpop.f32.mrf.mxu2 }
 0x377   : > { %v1127_v0 = vpop.f32.mrf.mxu0  ;;  %v1147_v1 = vpop.f32.mrf.mxu1 }
 0x378   : > { %v1128_v6 = vadd.f32 %v1127_v0, %v1047_v55  ;;  %v1148_v7 = vadd.f32 %v1147_v1, %v1067_v56  ;;  %v658_v0 = vld [vmem:[#allocation3] sm:$0xff] }
 0x37e   : > { %v1187_v8 = vpop.f32.mrf.mxu3  ;;  %v1167_v26 = vpop.f32.mrf.mxu2 }
 0x37f   : > { %v1188_v23 = vadd.f32 %v1187_v8, %v1107_v61  ;;  %v1168_v39 = vadd.f32 %v1167_v26, %v1087_v4  ;;  %v1481_v26 = vld [vmem:[#allocation15 + $0x50] sm:$0xff] }
 0x391   : > { %v1271_v12 = vpop.f32.mrf.mxu0  ;;  %v1291_v13 = vpop.f32.mrf.mxu1 }
 0x392   : > { %v1334_v14 = vadd.f32 %v1271_v12, %v1128_v6  ;;  %v1335_v15 = vadd.f32 %v1291_v13, %v1148_v7 }
 0x394   : > { %v1348_v17 = vadd.f32 %v1340_v9, %v1334_v14  ;;  %v1349_v18 = vadd.f32 %v1341_v10, %v1335_v15 }
 0x396   : > { %v1658_v20 = vmul.f32 -1.442695, %v1348_v17  ;;  %v1659_v21 = vmul.f32 -1.442695, %v1349_v18  ;;  %v1779_v18 = vld [vmem:[%s2387_s13] ss:$0 sm:$0xff] }
 0x398   : > { %1784 = vpow2.f32 %v1658_v20  ;;  %v1331_v27 = vpop.f32.mrf.mxu3  ;;  %v1311_v38 = vpop.f32.mrf.mxu2 }
 0x399   : > { %1786 = vpow2.f32 %v1659_v21  ;;  %v1337_v29 = vadd.f32 %v1331_v27, %v1188_v23  ;;  %v1336_v40 = vadd.f32 %v1311_v38, %v1168_v39  ;;  %v1486_v21 = vld [vmem:[#allocation15 + $0x78] sm:$0xff]  ;;  %v1484_v23 = vld [vmem:[#allocation15 + $0x68] sm:$0xff] }
 0x39a   : > { %1487 = vmatpush.msrb.mxu1 %v1486_v21  ;;  %v1480_v27 = vld [vmem:[#allocation15 + $0x48] sm:$0xff] }
 0x39b   : > { %v1351_v31 = vadd.f32 %v1343_v24, %v1337_v29  ;;  %v1350_v45 = vadd.f32 %v1342_v41, %v1336_v40  ;;  %v1483_v24 = vld [vmem:[#allocation15 + $0x60] sm:$0xff]  ;;  %v1478_v29 = vld [vmem:[#allocation15 + $0x38] sm:$0xff] }
 0x39c   : > { %1488 = vmatpush.msrb.mxu1 %v1485_v22  ;;  %v1471_v41 = vld [vmem:[#allocation15] sm:$0xff] }
 0x39d   : > { %v1660_v33 = vmul.f32 -1.442695, %v1351_v31  ;;  %v1476_v31 = vld [vmem:[#allocation15 + $0x28] sm:$0xff] }
 0x39e   : > { %v1785_v34 = vpop.eup %1784  ;;  %1489 = vmatpush.msrb.mxu1 %v1484_v23 }
 0x39f   : > { %v1787_v35 = vpop.eup %1786  ;;  %v1355_v36 = vadd.f32 1.0, %v1785_v34  ;;  %1788 = vpow2.f32 %v1660_v33  ;;  %v1475_v33 = vld [vmem:[#allocation15 + $0x20] sm:$0xff]  ;;  %v1474_v34 = vld [vmem:[#allocation15 + $0x18] sm:$0xff] }
 0x3a0   : > { %v1374_v37 = vadd.f32 1.0, %v1787_v35  ;;  %1490 = vmatpush.msrb.mxu1 %v1483_v24  ;;  %v1460_v35 = vand.u32 127, %v1459_v32 }
 0x3a1   : > { %1790 = vrcp.f32 %v1355_v36  ;;  %v1367_v51 = vand.u32 2147483648, %v1355_v36  ;;  %v1365_v54 = vand.u32 2147483647, %v1355_v36  ;;  %vm1361_vm2 = vweird.f32 %v1355_v36 }
 0x3a2   : > { %1792 = vrcp.f32 %v1374_v37  ;;  %v1386_v52 = vand.u32 2147483648, %v1374_v37  ;;  %v1384_v56 = vand.u32 2147483647, %v1374_v37  ;;  %vm1380_vm3 = vweird.f32 %v1374_v37  ;;  %1491 = vmatpush.msrb.mxu1 %v1482_v25 }
 0x3a3   : > { %v1368_v60 = vor.u32 1.1754944e-38, %v1367_v51  ;;  %vm1366_vm6 = vcmp.eq.f32.partialorder %v1365_v54, 8.507059e+37  ;;  %v1461_v38 = vcvt.s32.f32 %v1460_v35 }
 0x3a4   : > { %v1387_v63 = vor.u32 1.1754944e-38, %v1386_v52  ;;  %vm1385_vm7 = vcmp.eq.f32.partialorder %v1384_v56, 8.507059e+37  ;;  %1492 = vmatpush.msrb.mxu1 %v1481_v26 }
 0x3a5   : > { %v1789_v42 = vpop.eup %1788 }
 0x3a6   : > { %v1394_v43 = vadd.f32 1.0, %v1789_v42  ;;  %1493 = vmatpush.msrb.mxu1 %v1480_v27 }
 0x3a7   : > { %v1791_v44 = vpop.eup %1790 }
 0x3a8   : > { %v1793_v46 = vpop.eup %1792  ;;  %v1357_v47 = vmul.f32 %v1791_v44, %v1355_v36  ;;  %1794 = vrcp.f32 %v1394_v43  ;;  %vm1362_vm0 = vweird.f32 %v1791_v44  ;;  %v1406_v11 = vand.u32 2147483648, %v1394_v43  ;;  %1494 = vmatpush.msrb.mxu1 %v1479_v28  ;;  %v1473_v36 = vld [vmem:[#allocation15 + $0x10] sm:$0xff] }
 0x3a9   : > { %v1376_v48 = vmul.f32 %v1793_v46, %v1374_v37  ;;  %1796 = vtanh.f32 %v1350_v45  ;;  %vm1381_vm1 = vweird.f32 %v1793_v46  ;;  %vm1363_vm4 = vmor %vm1361_vm2, %vm1362_vm0  ;;  %vm1400_vm9 = vweird.f32 %v1394_v43  ;;  %v1472_v37 = vld [vmem:[#allocation15 + $0x8] sm:$0xff] }
 0x3aa   : > { %v1358_v49 = vsub.f32 1.0, %v1357_v47  ;;  %vm1382_vm5 = vmor %vm1380_vm3, %vm1381_vm1  ;;  %v1404_v12 = vand.u32 2147483647, %v1394_v43  ;;  %v1407_v14 = vor.u32 1.1754944e-38, %v1406_v11  ;;  %1495 = vmatpush.msrb.mxu1 %v1478_v29 }
 0x3ab   : > { %v1377_v50 = vsub.f32 1.0, %v1376_v48 }
 0x3ac   : > { %v1359_v53 = vmul.f32 %v1791_v44, %v1358_v49  ;;  %vm1405_vm11 = vcmp.eq.f32.partialorder %v1404_v12, 8.507059e+37  ;;  %1496 = vmatpush.msrb.mxu1 %v1477_v30 }
 0x3ad   : > { %v1378_v55 = vmul.f32 %v1793_v46, %v1377_v50 }
 0x3ae   : > { %v1795_v58 = vpop.eup %1794  ;;  %v1360_v59 = vadd.f32 %v1791_v44, %v1359_v53  ;;  %1497 = vmatpush.msrb.mxu1 %v1476_v31 }
 0x3af   : > { %v1379_v61 = vadd.f32 %v1793_v46, %v1378_v55  ;;  %v1396_v62 = vmul.f32 %v1795_v58, %v1394_v43  ;;  %v1797_v2 = vpop.eup %1796  ;;  %vm1401_vm8 = vweird.f32 %v1795_v58  ;;  %v2130_v43 = vmov 1.0  }
 0x3b0   : > { %v1364_v1 = vsel %vm1363_vm4, %v1791_v44, %v1360_v59  ;;  %vm1402_vm10 = vmor %vm1400_vm9, %vm1401_vm8  ;;  %1498 = vmatpush.msrb.mxu1 %v1475_v33 }
 0x3b1   : > { %v1369_v3 = vsel %vm1366_vm6, %v1368_v60, %v1364_v1  ;;  %v1383_v57 = vsel %vm1382_vm5, %v1793_v46, %v1379_v61  ;;  %v1397_v4 = vsub.f32 1.0, %v1396_v62 }
 0x3b2   : > { %v1388_v5 = vsel %vm1385_vm7, %v1387_v63, %v1383_v57  ;;  %v1411_v6 = vmul.f32 %v1797_v2, %v1369_v3  ;;  %1499 = vmatpush.msrb.mxu1 %v1474_v34 }
 0x3b3   : > { %v1410_v7 = vmul.f32 %v1388_v5, %v658_v0  ;;  %v1398_v8 = vmul.f32 %v1795_v58, %v1397_v4 }
 0x3b4   : > { %1500 = vmatpush.msrb.mxu1 %v1473_v36 }
 0x3b5   : > { %v1412_v9 = vadd.f32 %v1411_v6, %v1410_v7  ;;  %v1399_v10 = vadd.f32 %v1795_v58, %v1398_v8 }
 0x3b6   : > { %1501 = vmatpush.msrb.mxu1 %v1472_v37 }
 0x3b7   : > { %1798 = vtanh.f32 %v1412_v9  ;;  %1458 = vst [vmem:[#allocation3] sm:$0xff] %v1412_v9  ;;  %v1403_v13 = vsel %vm1402_vm10, %v1795_v58, %v1399_v10 }
 0x3b8   : > { %v1408_v16 = vsel %vm1405_vm11, %v1407_v14, %v1403_v13  ;;  %1502 = vmatpush.msrb.mxu1 %v1471_v41 }
 0x3bd   : > { %v1799_v15 = vpop.eup %1798 }
 0x3be   : > { %v1414_v17 = vmul.f32 %v1799_v15, %v1408_v16 }
 0x3c0   : > { %1451 = vmatmul.f32.vlgmr.msrb.gmra.mxu0 %v1414_v17  ;;  %1457 = vst [vmem:[#allocation2] sm:$0xff] %v1414_v17 }
 0x43d   : > { %v1452_v19 = vpop.f32.mrf.mxu0 }
 0x43e   : > { %v1453_v20 = vadd.f32 %v1779_v18, %v1452_v19 }
 0x440   : > { %1456 = vst [vmem:[%s1455_s29] sm:$0xff] %v1453_v20  ;;  %1462 = vmax.xlane.f32.xlu1 %v1453_v20 }
 0x441   : > { %1700 = dma.vmem_to_hbm [thread:$0]  (%p1744_p7), %s1514_s1, 640, %s1516_s26, [#allocation11], %s2131_s3, %s2131_s3, %s2132_s22  }
 0x4b3   : > { %v1463_v39 = vpop.xlane.xlu1 %1462 }
 0x4b4   : > { %vm1464_vm12 = vcmp.eq.f32.partialorder %v1453_v20, %v1463_v39 }
 0x4b5   : > { %v1465_v40 = vsel %vm1464_vm12, %v1461_v38, 128.0 }
 0x4b6   : > { %1466 = vmin.xlane.f32.xlu2 %v1465_v40 }
 0x529   : > { %v1467_v42 = vpop.xlane.xlu2 %1466 }
 0x52a   : > { %vm1468_vm13 = vcmp.eq.f32.partialorder %v1461_v38, %v1467_v42 }
 0x52b   : > { %1662 = vmatmul.msk.f32.vlgmr.msrb.gmra.mxu1 %vm1468_vm13, %v2130_v43 }
 0x5a8   : > { %v1504_v44 = vpop.f32.mrf.mxu1 }
 0x5a9   : > { %1507 = vst [vmem:[#allocation4] sm:$0xff] %v1504_v44 }
 0x5aa   : > { %2107 = dma.done.wait (%p1744_p7), [#allocation11], 640  }
 0x5ab   : > { %2109 = vsyncadd (%p1744_p7), [#allocation11], 4294966656 }
 0x5ac PF: > { %s40_s19 = sadd.s32 1, %s2112_s19  }
 0x5ad   : > { %p37_p8 = scmp.ge.s32.totalorder %s40_s19, 7  }
 0x5af   :  { %39 = sbr.rel (!%p37_p8) target bundleno = 14 (0xe), region = 135 }
 0x5b4   :  { %1532 = vsyncpa [#allocation10], 1 }
 0x5b5   :  { %1534 = vsyncpa [#allocation10 + $0x1], 1 }
 0x5b6   :  { %1535 = vsyncpa [#allocation13], 1 }
 0x5b7   :  { %1536 = vsyncpa [#allocation16], 1 }
 0x5b8   :  { %1537 = vsyncpa [#allocation19], 1 }
 0x5b9   :  { %1538 = vsyncpa [#allocation22], 1 }
 0x5ba   :  { %1539 = vsyncpa [#allocation11], 1 }
 0x5bb   :  { %1541 = vsyncpa [#allocation11 + $0x1], 1 }

</bundles_post_ra>
